<compile_context>
chip_gen: v5e
topology: v5e:2x2
jax: 0.10.0
libtpu: 0.0.40
codegen_flags: <defaults>
</compile_context>

<pallas_src>
import math

import jax
import jax.numpy as jnp
import numpy as np
from jax import lax
from jax.experimental import pallas as pl
from jax.experimental.pallas import tpu as pltpu

D_MODEL = 21
NHEAD = 7
HEAD_DIM = D_MODEL // NHEAD          # 3
DIM_FF = 2048
LN_EPS = 1e-5


def _layernorm(x, gamma, beta):
    mu = jnp.mean(x, axis=-1, keepdims=True)
    var = jnp.mean((x - mu) ** 2, axis=-1, keepdims=True)
    return (x - mu) * lax.rsqrt(var + LN_EPS) * gamma + beta


def encoder_layer_kernel(src_ref,             # (1, T, E) f32, T = batch_per_block * L
                         wqkv_ref, bqkv_ref,  # (E, 3E) bf16 (scale folded into Q cols), (1, 3E) f32
                         rep_ref,             # (R, T)  f32: token -> (batch, head, token) replication
                         rept_ref,            # (T, R)  f32: transpose of rep (head gather)
                         hm_ref,              # (R, E)  f32: per-row head column mask (0/1)
                         bias_ref,            # (R, T)  f32: 0 same-batch, -1e9 cross-batch
                         wo_ref, bo_ref,      # (E, E) bf16 = Wo^T, (1, E) f32
                         g1_ref, be1_ref,     # (1, E) f32
                         w1_ref, b1_ref,      # (E, F) bf16 = W1^T (lane-dense F), (1, F) f32
                         w2_ref, b2_ref,      # (F, E) bf16 = W2^T (canonical MXU layout), (1, E) f32
                         g2_ref, be2_ref,     # (1, E) f32
                         out_ref):            # (1, T, E) f32
    x = src_ref[0]                                                                       # (T, E)

    # ---- fused QKV projection: one matmul, bf16 operands, f32 accumulation ----
    qkv = jnp.dot(x.astype(jnp.bfloat16), wqkv_ref[...],
                  preferred_element_type=jnp.float32) + bqkv_ref[...]                    # (T, 3E)
    q = qkv[:, :D_MODEL]                    # already scaled by 1/sqrt(head_dim) via Wq
    k = qkv[:, D_MODEL:2 * D_MODEL]
    v = qkv[:, 2 * D_MODEL:]

    # ---- multi-head self-attention, block-diagonal form: 4 matmuls + ONE softmax ----
    # q_bd[r=(b,h,i), :] = q[(b,i), :] masked to head h's 3 columns.
    q_bd = jnp.dot(rep_ref[...], q, preferred_element_type=jnp.float32) * hm_ref[...]    # (R, E)
    # s[r=(b,h,i), t=(b',j)] = q_h[i] . k_h[j]; cross-batch entries killed by the bias.
    s = lax.dot_general(q_bd, k, (((1,), (1,)), ((), ())),
                        preferred_element_type=jnp.float32) + bias_ref[...]              # (R, T)
    s = s - jnp.max(s, axis=-1, keepdims=True)
    p = jnp.exp(s)
    p = p * pl.reciprocal(jnp.sum(p, axis=-1, keepdims=True), approx=True)
    # attn_rep[r=(b,h,i), :] = sum_j P_h[i, j] * v[(b,j), :]; head-h columns selected by hm.
    attn_rep = jnp.dot(p, v, preferred_element_type=jnp.float32) * hm_ref[...]           # (R, E)
    o = jnp.dot(rept_ref[...], attn_rep, preferred_element_type=jnp.float32)             # (T, E)

    # ---- single output projection for all heads / tokens ----
    attn = jnp.dot(o.astype(jnp.bfloat16), wo_ref[...],
                   preferred_element_type=jnp.float32) + bo_ref[...]

    # ---- residual + LayerNorm1 (dropout == identity) ----
    y = _layernorm(x + attn, g1_ref[...], be1_ref[...])

    # ---- feedforward: Linear -> ReLU -> Linear (bf16 operands, f32 accumulation) ----
    h1 = jnp.dot(y.astype(jnp.bfloat16), w1_ref[...],
                 preferred_element_type=jnp.float32) + b1_ref[...]                       # (T, F)
    h1 = jnp.maximum(h1, 0.0)
    ff = jnp.dot(h1.astype(jnp.bfloat16), w2_ref[...],
                 preferred_element_type=jnp.float32) + b2_ref[...]                       # (T, E)

    # ---- residual + LayerNorm2 ----
    out_ref[0] = _layernorm(y + ff, g2_ref[...], be2_ref[...])


def _attention_constants(batch_per_block, seq_len):
    """Constant replication / masking matrices for block-diagonal multi-head attention."""
    B, L, H, E, Dh = batch_per_block, seq_len, NHEAD, D_MODEL, HEAD_DIM
    R, T = B * H * L, B * L
    r = np.arange(R)
    r_b, r_h, r_i = r // (H * L), (r // L) % H, r % L
    t = np.arange(T)
    rep = ((r_b * L + r_i)[:, None] == t[None, :]).astype(np.float32)          # (R, T)
    hm = ((np.arange(E)[None, :] // Dh) == r_h[:, None]).astype(np.float32)    # (R, E)
    bias = np.where(r_b[:, None] == (t // L)[None, :], 0.0, -1e9).astype(np.float32)  # (R, T)
    return (jnp.asarray(rep), jnp.asarray(rep.T), jnp.asarray(hm), jnp.asarray(bias))


def transformer_encoder_layer(src_lne, params, num_batch_blocks=1):
    """src_lne: (L, N, E) float32, PyTorch (seq, batch, embed) layout."""
    L, N, E = src_lne.shape
    assert E == D_MODEL
    # Single grid step by default: v5e/v6e are single-TensorCore, so extra grid steps are
    # pure per-step overhead at these sizes. Use num_batch_blocks > 1 only on 2-TC chips
    # (v7x) or when T must be tiled to bound the (T, DIM_FF) FFN intermediate in VMEM.
    assert N % num_batch_blocks == 0
    batch_per_block = N // num_batch_blocks
    T = batch_per_block * L

    src = jnp.transpose(src_lne, (1, 0, 2)).astype(jnp.float32)                # (N, L, E)
    src = src.reshape(num_batch_blocks, T, E)

    scale = 1.0 / math.sqrt(HEAD_DIM)
    # Fused Q/K/V weights with the attention scale folded into the Q block:
    # (E, 3E) = [scale*Wq^T | Wk^T | Wv^T]
    wqkv = jnp.concatenate(
        [params['wq'].T * scale, params['wk'].T, params['wv'].T], axis=1)
    bqkv = jnp.concatenate(
        [params['bq'] * scale, params['bk'], params['bv']], axis=1)

    rep, rep_t, hm, bias = _attention_constants(batch_per_block, L)

    bf16 = lambda a: a.astype(jnp.bfloat16)
    args = (
        src,
        bf16(wqkv), bqkv.astype(jnp.float32),
        rep, rep_t, hm, bias,
        bf16(params['wo'].T), params['bo'],
        params['g1'], params['be1'],
        bf16(params['w1'].T), params['b1'],     # (E, F): lane-dense F
        bf16(params['w2'].T), params['b2'],     # (F, E): canonical MXU layout, no in-kernel transpose
        params['g2'], params['be2'],
    )

    # src/out are tiled over batch blocks; every other operand (weights, masks) uses a
    # constant block index so it is never re-fetched when the grid has > 1 step.
    in_specs = [pl.BlockSpec((1, T, E), lambda i: (i, 0, 0))] + \
               [pl.BlockSpec(a.shape, lambda i: (0, 0)) for a in args[1:]]

    out = pl.pallas_call(
        encoder_layer_kernel,
        grid=(num_batch_blocks,),
        out_shape=jax.ShapeDtypeStruct((num_batch_blocks, T, E), jnp.float32),
        in_specs=in_specs,
        out_specs=pl.BlockSpec((1, T, E), lambda i: (i, 0, 0)),
        compiler_params=pltpu.CompilerParams(
            dimension_semantics=("parallel",) if num_batch_blocks > 1 else ("arbitrary",)),
    )(*args)

    out = out.reshape(N, L, E)
    return jnp.transpose(out, (1, 0, 2))                                        # back to (L, N, E)


def init_params(key):
    ks = jax.random.split(key, 16)

    def u(k, shape, fan_in):
        bound = 1.0 / math.sqrt(fan_in)
        return jax.random.uniform(k, shape, jnp.float32, -bound, bound)

    return dict(
        wq=u(ks[0], (D_MODEL, D_MODEL), D_MODEL),
        wk=u(ks[1], (D_MODEL, D_MODEL), D_MODEL),
        wv=u(ks[2], (D_MODEL, D_MODEL), D_MODEL),
        bq=u(ks[3], (1, D_MODEL), D_MODEL),
        bk=u(ks[4], (1, D_MODEL), D_MODEL),
        bv=u(ks[5], (1, D_MODEL), D_MODEL),
        wo=u(ks[6], (D_MODEL, D_MODEL), D_MODEL),
        bo=u(ks[7], (1, D_MODEL), D_MODEL),
        w1=u(ks[8], (DIM_FF, D_MODEL), D_MODEL),
        b1=u(ks[9], (1, DIM_FF), D_MODEL),
        w2=u(ks[10], (D_MODEL, DIM_FF), DIM_FF),
        b2=u(ks[11], (1, D_MODEL), DIM_FF),
        g1=jnp.ones((1, D_MODEL), jnp.float32),
        be1=jnp.zeros((1, D_MODEL), jnp.float32),
        g2=jnp.ones((1, D_MODEL), jnp.float32),
        be2=jnp.zeros((1, D_MODEL), jnp.float32),
    )


def reference(src_lne, p):
    """Pure-JAX f32 reference with PyTorch semantics (dropout == identity)."""
    L, N, E = src_lne.shape
    x = src_lne
    q = x @ p['wq'].T + p['bq'][0]
    k = x @ p['wk'].T + p['bk'][0]
    v = x @ p['wv'].T + p['bv'][0]

    def heads(t):  # (L, N, E) -> (N, H, L, D)
        return jnp.transpose(t.reshape(L, N, NHEAD, HEAD_DIM), (1, 2, 0, 3))

    qh, kh, vh = heads(q), heads(k), heads(v)
    s = jnp.einsum('nhld,nhmd->nhlm', qh / math.sqrt(HEAD_DIM), kh)
    a = jax.nn.softmax(s, axis=-1)
    o = jnp.einsum('nhlm,nhmd->nhld', a, vh)
    o = jnp.transpose(o, (2, 0, 1, 3)).reshape(L, N, E)
    attn = o @ p['wo'].T + p['bo'][0]

    x = _layernorm(x + attn, p['g1'][0], p['be1'][0])
    ff = jax.nn.relu(x @ p['w1'].T + p['b1'][0]) @ p['w2'].T + p['b2'][0]
    x = _layernorm(x + ff, p['g2'][0], p['be2'][0])
    return x


if __name__ == "__main__":
    key = jax.random.PRNGKey(0)
    k_src, k_par = jax.random.split(key)

    L, N = 8, 2                                  # seq=8, batch=2, d_model=21
    src = jax.random.normal(k_src, (L, N, D_MODEL), jnp.float32)
    params = init_params(k_par)

    out = transformer_encoder_layer(src, params)
    out = jax.block_until_ready(out)

    ref = reference(src, params)
    assert out.shape == (L, N, D_MODEL)
    assert bool(jnp.all(jnp.isfinite(out)))
    max_err = float(jnp.max(jnp.abs(out - ref)))
    assert max_err < 5e-2, f"max abs err {max_err}"

    print("KERNEL_OK")
</pallas_src>

<mosaic_0001>
module attributes {stable_mosaic.version = 11 : i64} {
  func.func @encoder_layer_kernel(%arg0: i32, %arg1: memref<1x16x21xf32, #tpu.memory_space<vmem>>, %arg2: memref<21x63xbf16, #tpu.memory_space<vmem>>, %arg3: memref<1x63xf32, #tpu.memory_space<vmem>>, %arg4: memref<112x16xf32, #tpu.memory_space<vmem>>, %arg5: memref<16x112xf32, #tpu.memory_space<vmem>>, %arg6: memref<112x21xf32, #tpu.memory_space<vmem>>, %arg7: memref<112x16xf32, #tpu.memory_space<vmem>>, %arg8: memref<21x21xbf16, #tpu.memory_space<vmem>>, %arg9: memref<1x21xf32, #tpu.memory_space<vmem>>, %arg10: memref<1x21xf32, #tpu.memory_space<vmem>>, %arg11: memref<1x21xf32, #tpu.memory_space<vmem>>, %arg12: memref<21x2048xbf16, #tpu.memory_space<vmem>>, %arg13: memref<1x2048xf32, #tpu.memory_space<vmem>>, %arg14: memref<2048x21xbf16, #tpu.memory_space<vmem>>, %arg15: memref<1x21xf32, #tpu.memory_space<vmem>>, %arg16: memref<1x21xf32, #tpu.memory_space<vmem>>, %arg17: memref<1x21xf32, #tpu.memory_space<vmem>>, %arg18: memref<1x16x21xf32, #tpu.memory_space<vmem>>) attributes {dimension_semantics = [#tpu.dimension_semantics<arbitrary>], iteration_bounds = array<i64: 1>, scalar_prefetch = 0 : i64, scratch_operands = 0 : i64, tpu.core_type = #tpu.core_type<tc>, window_params = [{transform_indices = @transform_0, window_bounds = array<i64: 1, 16, 21>}, {pipeline_mode = #tpu.pipeline_mode<synchronous>, transform_indices = @transform_1, window_bounds = array<i64: 21, 63>}, {pipeline_mode = #tpu.pipeline_mode<synchronous>, transform_indices = @transform_2, window_bounds = array<i64: 1, 63>}, {pipeline_mode = #tpu.pipeline_mode<synchronous>, transform_indices = @transform_3, window_bounds = array<i64: 112, 16>}, {pipeline_mode = #tpu.pipeline_mode<synchronous>, transform_indices = @transform_4, window_bounds = array<i64: 16, 112>}, {pipeline_mode = #tpu.pipeline_mode<synchronous>, transform_indices = @transform_5, window_bounds = array<i64: 112, 21>}, {pipeline_mode = #tpu.pipeline_mode<synchronous>, transform_indices = @transform_6, window_bounds = array<i64: 112, 16>}, {pipeline_mode = #tpu.pipeline_mode<synchronous>, transform_indices = @transform_7, window_bounds = array<i64: 21, 21>}, {pipeline_mode = #tpu.pipeline_mode<synchronous>, transform_indices = @transform_8, window_bounds = array<i64: 1, 21>}, {pipeline_mode = #tpu.pipeline_mode<synchronous>, transform_indices = @transform_9, window_bounds = array<i64: 1, 21>}, {pipeline_mode = #tpu.pipeline_mode<synchronous>, transform_indices = @transform_10, window_bounds = array<i64: 1, 21>}, {pipeline_mode = #tpu.pipeline_mode<synchronous>, transform_indices = @transform_11, window_bounds = array<i64: 21, 2048>}, {pipeline_mode = #tpu.pipeline_mode<synchronous>, transform_indices = @transform_12, window_bounds = array<i64: 1, 2048>}, {pipeline_mode = #tpu.pipeline_mode<synchronous>, transform_indices = @transform_13, window_bounds = array<i64: 2048, 21>}, {pipeline_mode = #tpu.pipeline_mode<synchronous>, transform_indices = @transform_14, window_bounds = array<i64: 1, 21>}, {pipeline_mode = #tpu.pipeline_mode<synchronous>, transform_indices = @transform_15, window_bounds = array<i64: 1, 21>}, {pipeline_mode = #tpu.pipeline_mode<synchronous>, transform_indices = @transform_16, window_bounds = array<i64: 1, 21>}, {transform_indices = @transform_17, window_bounds = array<i64: 1, 16, 21>}]} {
    %c0 = arith.constant 0 : index
    %c0_0 = arith.constant 0 : index
    %c0_1 = arith.constant 0 : index
    %0 = vector.load %arg1[%c0, %c0_0, %c0_1] : memref<1x16x21xf32, #tpu.memory_space<vmem>>, vector<1x16x21xf32>
    %1 = vector.shape_cast %0 : vector<1x16x21xf32> to vector<16x21xf32>
    %2 = arith.truncf %1 : vector<16x21xf32> to vector<16x21xbf16>
    %c0_2 = arith.constant 0 : index
    %c0_3 = arith.constant 0 : index
    %3 = vector.load %arg2[%c0_2, %c0_3] : memref<21x63xbf16, #tpu.memory_space<vmem>>, vector<21x63xbf16>
    %cst = arith.constant dense<0.000000e+00> : vector<16x63xf32>
    %4 = tpu.matmul %2, %3, %cst {dimension_numbers = #tpu.dot_dimension_numbers<[1], [0], [0], [1], [0, 0, 1, 1], [], []>} : vector<16x21xbf16>, vector<21x63xbf16>, vector<16x63xf32> -> vector<16x63xf32>
    %c0_4 = arith.constant 0 : index
    %c0_5 = arith.constant 0 : index
    %5 = vector.load %arg3[%c0_4, %c0_5] : memref<1x63xf32, #tpu.memory_space<vmem>>, vector<1x63xf32>
    %6 = vector.broadcast %5 : vector<1x63xf32> to vector<16x63xf32>
    %7 = arith.addf %4, %6 : vector<16x63xf32>
    %8 = vector.extract_strided_slice %7 {offsets = [0, 0], sizes = [16, 21], strides = [1, 1]} : vector<16x63xf32> to vector<16x21xf32>
    %9 = vector.extract_strided_slice %7 {offsets = [0, 21], sizes = [16, 21], strides = [1, 1]} : vector<16x63xf32> to vector<16x21xf32>
    %10 = vector.extract_strided_slice %7 {offsets = [0, 42], sizes = [16, 21], strides = [1, 1]} : vector<16x63xf32> to vector<16x21xf32>
    %c0_6 = arith.constant 0 : index
    %c0_7 = arith.constant 0 : index
    %11 = vector.load %arg4[%c0_6, %c0_7] : memref<112x16xf32, #tpu.memory_space<vmem>>, vector<112x16xf32>
    %cst_8 = arith.constant dense<0.000000e+00> : vector<112x21xf32>
    %12 = tpu.matmul %11, %8, %cst_8 {dimension_numbers = #tpu.dot_dimension_numbers<[1], [0], [0], [1], [0, 0, 1, 1], [], []>} : vector<112x16xf32>, vector<16x21xf32>, vector<112x21xf32> -> vector<112x21xf32>
    %c0_9 = arith.constant 0 : index
    %c0_10 = arith.constant 0 : index
    %13 = vector.load %arg6[%c0_9, %c0_10] : memref<112x21xf32, #tpu.memory_space<vmem>>, vector<112x21xf32>
    %14 = arith.mulf %12, %13 : vector<112x21xf32>
    %cst_11 = arith.constant dense<0.000000e+00> : vector<112x16xf32>
    %15 = tpu.matmul %14, %9, %cst_11 {dimension_numbers = #tpu.dot_dimension_numbers<[1], [1], [0], [0], [0, 0, 1, 0], [], []>} : vector<112x21xf32>, vector<16x21xf32>, vector<112x16xf32> -> vector<112x16xf32>
    %c0_12 = arith.constant 0 : index
    %c0_13 = arith.constant 0 : index
    %16 = vector.load %arg7[%c0_12, %c0_13] : memref<112x16xf32, #tpu.memory_space<vmem>>, vector<112x16xf32>
    %17 = arith.addf %15, %16 : vector<112x16xf32>
    %cst_14 = arith.constant dense<0xFF800000> : vector<112xf32>
    %18 = vector.multi_reduction <maximumf>, %17, %cst_14 [1] : vector<112x16xf32> to vector<112xf32>
    %19 = vector.shape_cast %18 : vector<112xf32> to vector<112x1xf32>
    %20 = vector.broadcast %19 : vector<112x1xf32> to vector<112x16xf32>
    %21 = arith.subf %17, %20 : vector<112x16xf32>
    %22 = math.exp %21 : vector<112x16xf32>
    %cst_15 = arith.constant dense<0.000000e+00> : vector<112xf32>
    %23 = vector.multi_reduction <add>, %22, %cst_15 [1] : vector<112x16xf32> to vector<112xf32>
    %24 = vector.shape_cast %23 : vector<112xf32> to vector<112x1xf32>
    %25 = tpu.reciprocal %24 {approx = true} : vector<112x1xf32> -> vector<112x1xf32>
    %26 = vector.broadcast %25 : vector<112x1xf32> to vector<112x16xf32>
    %27 = arith.mulf %22, %26 : vector<112x16xf32>
    %cst_16 = arith.constant dense<0.000000e+00> : vector<112x21xf32>
    %28 = tpu.matmul %27, %10, %cst_16 {dimension_numbers = #tpu.dot_dimension_numbers<[1], [0], [0], [1], [0, 0, 1, 1], [], []>} : vector<112x16xf32>, vector<16x21xf32>, vector<112x21xf32> -> vector<112x21xf32>
    %c0_17 = arith.constant 0 : index
    %c0_18 = arith.constant 0 : index
    %29 = vector.load %arg6[%c0_17, %c0_18] : memref<112x21xf32, #tpu.memory_space<vmem>>, vector<112x21xf32>
    %30 = arith.mulf %28, %29 : vector<112x21xf32>
    %c0_19 = arith.constant 0 : index
    %c0_20 = arith.constant 0 : index
    %31 = vector.load %arg5[%c0_19, %c0_20] : memref<16x112xf32, #tpu.memory_space<vmem>>, vector<16x112xf32>
    %cst_21 = arith.constant dense<0.000000e+00> : vector<16x21xf32>
    %32 = tpu.matmul %31, %30, %cst_21 {dimension_numbers = #tpu.dot_dimension_numbers<[1], [0], [0], [1], [0, 0, 1, 1], [], []>} : vector<16x112xf32>, vector<112x21xf32>, vector<16x21xf32> -> vector<16x21xf32>
    %33 = arith.truncf %32 : vector<16x21xf32> to vector<16x21xbf16>
    %c0_22 = arith.constant 0 : index
    %c0_23 = arith.constant 0 : index
    %34 = vector.load %arg8[%c0_22, %c0_23] : memref<21x21xbf16, #tpu.memory_space<vmem>>, vector<21x21xbf16>
    %cst_24 = arith.constant dense<0.000000e+00> : vector<16x21xf32>
    %35 = tpu.matmul %33, %34, %cst_24 {dimension_numbers = #tpu.dot_dimension_numbers<[1], [0], [0], [1], [0, 0, 1, 1], [], []>} : vector<16x21xbf16>, vector<21x21xbf16>, vector<16x21xf32> -> vector<16x21xf32>
    %c0_25 = arith.constant 0 : index
    %c0_26 = arith.constant 0 : index
    %36 = vector.load %arg9[%c0_25, %c0_26] : memref<1x21xf32, #tpu.memory_space<vmem>>, vector<1x21xf32>
    %37 = vector.broadcast %36 : vector<1x21xf32> to vector<16x21xf32>
    %38 = arith.addf %35, %37 : vector<16x21xf32>
    %39 = arith.addf %1, %38 : vector<16x21xf32>
    %c0_27 = arith.constant 0 : index
    %c0_28 = arith.constant 0 : index
    %40 = vector.load %arg10[%c0_27, %c0_28] : memref<1x21xf32, #tpu.memory_space<vmem>>, vector<1x21xf32>
    %c0_29 = arith.constant 0 : index
    %c0_30 = arith.constant 0 : index
    %41 = vector.load %arg11[%c0_29, %c0_30] : memref<1x21xf32, #tpu.memory_space<vmem>>, vector<1x21xf32>
    %cst_31 = arith.constant dense<0.000000e+00> : vector<16xf32>
    %42 = vector.multi_reduction <add>, %39, %cst_31 [1] : vector<16x21xf32> to vector<16xf32>
    %43 = vector.shape_cast %42 : vector<16xf32> to vector<16x1xf32>
    %cst_32 = arith.constant 2.100000e+01 : f32
    %44 = vector.broadcast %cst_32 : f32 to vector<16x1xf32>
    %45 = arith.divf %43, %44 : vector<16x1xf32>
    %46 = vector.broadcast %45 : vector<16x1xf32> to vector<16x21xf32>
    %47 = arith.subf %39, %46 : vector<16x21xf32>
    %48 = arith.mulf %47, %47 : vector<16x21xf32>
    %cst_33 = arith.constant dense<0.000000e+00> : vector<16xf32>
    %49 = vector.multi_reduction <add>, %48, %cst_33 [1] : vector<16x21xf32> to vector<16xf32>
    %50 = vector.shape_cast %49 : vector<16xf32> to vector<16x1xf32>
    %cst_34 = arith.constant 2.100000e+01 : f32
    %51 = vector.broadcast %cst_34 : f32 to vector<16x1xf32>
    %52 = arith.divf %50, %51 : vector<16x1xf32>
    %53 = vector.broadcast %45 : vector<16x1xf32> to vector<16x21xf32>
    %54 = arith.subf %39, %53 : vector<16x21xf32>
    %cst_35 = arith.constant 9.99999974E-6 : f32
    %55 = vector.broadcast %cst_35 : f32 to vector<16x1xf32>
    %56 = arith.addf %52, %55 : vector<16x1xf32>
    %57 = math.rsqrt %56 : vector<16x1xf32>
    %58 = vector.broadcast %57 : vector<16x1xf32> to vector<16x21xf32>
    %59 = arith.mulf %54, %58 : vector<16x21xf32>
    %60 = vector.broadcast %40 : vector<1x21xf32> to vector<16x21xf32>
    %61 = arith.mulf %59, %60 : vector<16x21xf32>
    %62 = vector.broadcast %41 : vector<1x21xf32> to vector<16x21xf32>
    %63 = arith.addf %61, %62 : vector<16x21xf32>
    %64 = arith.truncf %63 : vector<16x21xf32> to vector<16x21xbf16>
    %c0_36 = arith.constant 0 : index
    %c0_37 = arith.constant 0 : index
    %65 = vector.load %arg12[%c0_36, %c0_37] : memref<21x2048xbf16, #tpu.memory_space<vmem>>, vector<21x2048xbf16>
    %cst_38 = arith.constant dense<0.000000e+00> : vector<16x2048xf32>
    %66 = tpu.matmul %64, %65, %cst_38 {dimension_numbers = #tpu.dot_dimension_numbers<[1], [0], [0], [1], [0, 0, 1, 1], [], []>} : vector<16x21xbf16>, vector<21x2048xbf16>, vector<16x2048xf32> -> vector<16x2048xf32>
    %c0_39 = arith.constant 0 : index
    %c0_40 = arith.constant 0 : index
    %67 = vector.load %arg13[%c0_39, %c0_40] : memref<1x2048xf32, #tpu.memory_space<vmem>>, vector<1x2048xf32>
    %68 = vector.broadcast %67 : vector<1x2048xf32> to vector<16x2048xf32>
    %69 = arith.addf %66, %68 : vector<16x2048xf32>
    %cst_41 = arith.constant 0.000000e+00 : f32
    %70 = vector.broadcast %cst_41 : f32 to vector<16x2048xf32>
    %71 = arith.maximumf %69, %70 : vector<16x2048xf32>
    %72 = arith.truncf %71 : vector<16x2048xf32> to vector<16x2048xbf16>
    %c0_42 = arith.constant 0 : index
    %c0_43 = arith.constant 0 : index
    %73 = vector.load %arg14[%c0_42, %c0_43] : memref<2048x21xbf16, #tpu.memory_space<vmem>>, vector<2048x21xbf16>
    %cst_44 = arith.constant dense<0.000000e+00> : vector<16x21xf32>
    %74 = tpu.matmul %72, %73, %cst_44 {dimension_numbers = #tpu.dot_dimension_numbers<[1], [0], [0], [1], [0, 0, 1, 1], [], []>} : vector<16x2048xbf16>, vector<2048x21xbf16>, vector<16x21xf32> -> vector<16x21xf32>
    %c0_45 = arith.constant 0 : index
    %c0_46 = arith.constant 0 : index
    %75 = vector.load %arg15[%c0_45, %c0_46] : memref<1x21xf32, #tpu.memory_space<vmem>>, vector<1x21xf32>
    %76 = vector.broadcast %75 : vector<1x21xf32> to vector<16x21xf32>
    %77 = arith.addf %74, %76 : vector<16x21xf32>
    %78 = arith.addf %63, %77 : vector<16x21xf32>
    %c0_47 = arith.constant 0 : index
    %c0_48 = arith.constant 0 : index
    %79 = vector.load %arg16[%c0_47, %c0_48] : memref<1x21xf32, #tpu.memory_space<vmem>>, vector<1x21xf32>
    %c0_49 = arith.constant 0 : index
    %c0_50 = arith.constant 0 : index
    %80 = vector.load %arg17[%c0_49, %c0_50] : memref<1x21xf32, #tpu.memory_space<vmem>>, vector<1x21xf32>
    %cst_51 = arith.constant dense<0.000000e+00> : vector<16xf32>
    %81 = vector.multi_reduction <add>, %78, %cst_51 [1] : vector<16x21xf32> to vector<16xf32>
    %82 = vector.shape_cast %81 : vector<16xf32> to vector<16x1xf32>
    %cst_52 = arith.constant 2.100000e+01 : f32
    %83 = vector.broadcast %cst_52 : f32 to vector<16x1xf32>
    %84 = arith.divf %82, %83 : vector<16x1xf32>
    %85 = vector.broadcast %84 : vector<16x1xf32> to vector<16x21xf32>
    %86 = arith.subf %78, %85 : vector<16x21xf32>
    %87 = arith.mulf %86, %86 : vector<16x21xf32>
    %cst_53 = arith.constant dense<0.000000e+00> : vector<16xf32>
    %88 = vector.multi_reduction <add>, %87, %cst_53 [1] : vector<16x21xf32> to vector<16xf32>
    %89 = vector.shape_cast %88 : vector<16xf32> to vector<16x1xf32>
    %cst_54 = arith.constant 2.100000e+01 : f32
    %90 = vector.broadcast %cst_54 : f32 to vector<16x1xf32>
    %91 = arith.divf %89, %90 : vector<16x1xf32>
    %92 = vector.broadcast %84 : vector<16x1xf32> to vector<16x21xf32>
    %93 = arith.subf %78, %92 : vector<16x21xf32>
    %cst_55 = arith.constant 9.99999974E-6 : f32
    %94 = vector.broadcast %cst_55 : f32 to vector<16x1xf32>
    %95 = arith.addf %91, %94 : vector<16x1xf32>
    %96 = math.rsqrt %95 : vector<16x1xf32>
    %97 = vector.broadcast %96 : vector<16x1xf32> to vector<16x21xf32>
    %98 = arith.mulf %93, %97 : vector<16x21xf32>
    %99 = vector.broadcast %79 : vector<1x21xf32> to vector<16x21xf32>
    %100 = arith.mulf %98, %99 : vector<16x21xf32>
    %101 = vector.broadcast %80 : vector<1x21xf32> to vector<16x21xf32>
    %102 = arith.addf %100, %101 : vector<16x21xf32>
    %c0_56 = arith.constant 0 : index
    %c0_57 = arith.constant 0 : index
    %c0_58 = arith.constant 0 : index
    %103 = vector.load %arg18[%c0_56, %c0_57, %c0_58] : memref<1x16x21xf32, #tpu.memory_space<vmem>>, vector<1x16x21xf32>
    %104 = vector.shape_cast %103 : vector<1x16x21xf32> to vector<16x21xf32>
    %105 = vector.shape_cast %102 : vector<16x21xf32> to vector<1x16x21xf32>
    tpu.vector_store %arg18[%c0_56, %c0_57, %c0_58], %105 {strides = array<i32>} : memref<1x16x21xf32, #tpu.memory_space<vmem>>, vector<1x16x21xf32>,
    return
  }
  func.func @transform_0(%arg0: i32) -> (i32, i32, i32) {
    %c0_i32 = arith.constant 0 : i32
    %c0_i32_0 = arith.constant 0 : i32
    %c0_i32_1 = arith.constant 0 : i32
    return %arg0, %c0_i32, %c0_i32_0 : i32, i32, i32
  }
  func.func @transform_1(%arg0: i32) -> (i32, i32) {
    %c0_i32 = arith.constant 0 : i32
    %c0_i32_0 = arith.constant 0 : i32
    %c0_i32_1 = arith.constant 0 : i32
    return %c0_i32, %c0_i32_0 : i32, i32
  }
  func.func @transform_2(%arg0: i32) -> (i32, i32) {
    %c0_i32 = arith.constant 0 : i32
    %c0_i32_0 = arith.constant 0 : i32
    %c0_i32_1 = arith.constant 0 : i32
    return %c0_i32, %c0_i32_0 : i32, i32
  }
  func.func @transform_3(%arg0: i32) -> (i32, i32) {
    %c0_i32 = arith.constant 0 : i32
    %c0_i32_0 = arith.constant 0 : i32
    %c0_i32_1 = arith.constant 0 : i32
    return %c0_i32, %c0_i32_0 : i32, i32
  }
  func.func @transform_4(%arg0: i32) -> (i32, i32) {
    %c0_i32 = arith.constant 0 : i32
    %c0_i32_0 = arith.constant 0 : i32
    %c0_i32_1 = arith.constant 0 : i32
    return %c0_i32, %c0_i32_0 : i32, i32
  }
  func.func @transform_5(%arg0: i32) -> (i32, i32) {
    %c0_i32 = arith.constant 0 : i32
    %c0_i32_0 = arith.constant 0 : i32
    %c0_i32_1 = arith.constant 0 : i32
    return %c0_i32, %c0_i32_0 : i32, i32
  }
  func.func @transform_6(%arg0: i32) -> (i32, i32) {
    %c0_i32 = arith.constant 0 : i32
    %c0_i32_0 = arith.constant 0 : i32
    %c0_i32_1 = arith.constant 0 : i32
    return %c0_i32, %c0_i32_0 : i32, i32
  }
  func.func @transform_7(%arg0: i32) -> (i32, i32) {
    %c0_i32 = arith.constant 0 : i32
    %c0_i32_0 = arith.constant 0 : i32
    %c0_i32_1 = arith.constant 0 : i32
    return %c0_i32, %c0_i32_0 : i32, i32
  }
  func.func @transform_8(%arg0: i32) -> (i32, i32) {
    %c0_i32 = arith.constant 0 : i32
    %c0_i32_0 = arith.constant 0 : i32
    %c0_i32_1 = arith.constant 0 : i32
    return %c0_i32, %c0_i32_0 : i32, i32
  }
  func.func @transform_9(%arg0: i32) -> (i32, i32) {
    %c0_i32 = arith.constant 0 : i32
    %c0_i32_0 = arith.constant 0 : i32
    %c0_i32_1 = arith.constant 0 : i32
    return %c0_i32, %c0_i32_0 : i32, i32
  }
  func.func @transform_10(%arg0: i32) -> (i32, i32) {
    %c0_i32 = arith.constant 0 : i32
    %c0_i32_0 = arith.constant 0 : i32
    %c0_i32_1 = arith.constant 0 : i32
    return %c0_i32, %c0_i32_0 : i32, i32
  }
  func.func @transform_11(%arg0: i32) -> (i32, i32) {
    %c0_i32 = arith.constant 0 : i32
    %c0_i32_0 = arith.constant 0 : i32
    %c0_i32_1 = arith.constant 0 : i32
    return %c0_i32, %c0_i32_0 : i32, i32
  }
  func.func @transform_12(%arg0: i32) -> (i32, i32) {
    %c0_i32 = arith.constant 0 : i32
    %c0_i32_0 = arith.constant 0 : i32
    %c0_i32_1 = arith.constant 0 : i32
    return %c0_i32, %c0_i32_0 : i32, i32
  }
  func.func @transform_13(%arg0: i32) -> (i32, i32) {
    %c0_i32 = arith.constant 0 : i32
    %c0_i32_0 = arith.constant 0 : i32
    %c0_i32_1 = arith.constant 0 : i32
    return %c0_i32, %c0_i32_0 : i32, i32
  }
  func.func @transform_14(%arg0: i32) -> (i32, i32) {
    %c0_i32 = arith.constant 0 : i32
    %c0_i32_0 = arith.constant 0 : i32
    %c0_i32_1 = arith.constant 0 : i32
    return %c0_i32, %c0_i32_0 : i32, i32
  }
  func.func @transform_15(%arg0: i32) -> (i32, i32) {
    %c0_i32 = arith.constant 0 : i32
    %c0_i32_0 = arith.constant 0 : i32
    %c0_i32_1 = arith.constant 0 : i32
    return %c0_i32, %c0_i32_0 : i32, i32
  }
  func.func @transform_16(%arg0: i32) -> (i32, i32) {
    %c0_i32 = arith.constant 0 : i32
    %c0_i32_0 = arith.constant 0 : i32
    %c0_i32_1 = arith.constant 0 : i32
    return %c0_i32, %c0_i32_0 : i32, i32
  }
  func.func @transform_17(%arg0: i32) -> (i32, i32, i32) {
    %c0_i32 = arith.constant 0 : i32
    %c0_i32_0 = arith.constant 0 : i32
    %c0_i32_1 = arith.constant 0 : i32
    return %arg0, %c0_i32, %c0_i32_0 : i32, i32, i32
  }
}

</mosaic_0001>

<bundles_post_ra>
// kernel: tpu_custom_call.1
= control target key start
LH: loop header
LB: loop body
LE: loop exit
PB: predicated region body
PF: predicated region fallthrough
CT: control target
= control target key end

     0   :  { %s4693_s0 = inlined_call_operand.vmem [shape: f32[1,16,21], index: 0, kind: input, shape index: {}]   ;;  %s4694_s1 = inlined_call_operand.vmem [shape: bf16[21,63], index: 1, kind: input, shape index: {}]   ;;  %s4695_s2 = inlined_call_operand.vmem [shape: f32[1,63], index: 2, kind: input, shape index: {}]   ;;  %s4696_s3 = inlined_call_operand.vmem [shape: f32[112,16], index: 3, kind: input, shape index: {}]   ;;  %s4697_s4 = inlined_call_operand.vmem [shape: f32[16,112], index: 4, kind: input, shape index: {}]   ;;  %s4698_s5 = inlined_call_operand.vmem [shape: f32[112,21], index: 5, kind: input, shape index: {}]   ;;  %s4699_s6 = inlined_call_operand.vmem [shape: f32[112,16], index: 6, kind: input, shape index: {}]   ;;  %s4700_s7 = inlined_call_operand.vmem [shape: bf16[21,21], index: 7, kind: input, shape index: {}]   ;;  %s4701_s8 = inlined_call_operand.vmem [shape: f32[1,21], index: 8, kind: input, shape index: {}]   ;;  %s4702_s9 = inlined_call_operand.vmem [shape: f32[1,21], index: 9, kind: input, shape index: {}]   ;;  %s4703_s10 = inlined_call_operand.vmem [shape: f32[1,21], index: 10, kind: input, shape index: {}]   ;;  %s4704_s11 = inlined_call_operand.vmem [shape: bf16[21,2048], index: 11, kind: input, shape index: {}]   ;;  %s4705_s12 = inlined_call_operand.vmem [shape: f32[1,2048], index: 12, kind: input, shape index: {}]   ;;  %s4706_s13 = inlined_call_operand.vmem [shape: bf16[2048,21], index: 13, kind: input, shape index: {}]   ;;  %s4707_s14 = inlined_call_operand.vmem [shape: f32[1,21], index: 14, kind: input, shape index: {}]   ;;  %s4708_s15 = inlined_call_operand.vmem [shape: f32[1,21], index: 15, kind: input, shape index: {}]   ;;  %s4709_s16 = inlined_call_operand.vmem [shape: f32[1,21], index: 16, kind: input, shape index: {}]   ;;  %s4710_s17 = inlined_call_operand.hbm [shape: f32[1,16,21], index: 17, kind: output, shape index: {}]  }
   0x1   :  { %4713 = sst [smem:[#allocation5_spill]] %s4693_s0 }
   0x2   :  { %4714 = sst [smem:[#allocation6_spill]] %s4694_s1 }
   0x3   :  { %s4715_s26 = sld [smem:[#allocation6_spill]]  ;;  %vm81_vm0 = vcmask 1041408   ;;  %vm82_vm1 = vcmask 1042432   ;;  %v3533_v2 = vmov 65535  }
   0x4   :  { %v83_v3 = vsel %vm81_vm0, 4294967295, %v3533_v2 }
   0x5   :  { %v3633_v4 = vsel %vm82_vm1, %v83_v3, 0 }
   0x9   :  { %v63_v0 = vld [vmem:[%s4715_s26 + $0x8] sm:$0x7] }
   0xa   :  { %v73_v1 = vunpack.c.l.b16 %v63_v0 }
   0xc   :  { %v75_v5 = vpack.c.b16 %v73_v1, %v73_v1 }
   0xd   :  { %22 = vsyncpa [#allocation3], 0  ;;  %v3262_v7 = vld [vmem:[%s4715_s26] sm:$0xff]  ;;  %s4716_s30 = sld [smem:[#allocation5_spill]]  ;;  %vm77_vm2 = vcmask 171008   ;;  %s3534_s21 = smov 107  }
   0xe   :  { %v86_v6 = vand.u32 %v3633_v4, %v75_v5  ;;  %v3434_v12 = vld [vmem:[%s4695_s2] ss:$0 sm:$0xff]  ;;  %vm116_vm3 = vcmask 130048   ;;  %v103_v18 = vld [vmem:[%s4696_s3 + $0x8] sm:$0xff]  ;;  %v104_v19 = vld [vmem:[%s4696_s3 + $0x10] sm:$0xff]  ;;  %vm648_vm4 = vcmask 916480  }
   0xf   :  { %v102_v16 = vld [vmem:[%s4696_s3] sm:$0xff]  ;;  %v105_v20 = vld [vmem:[%s4696_s3 + $0x18] sm:$0xff]  ;;  %v107_v22 = vld [vmem:[%s4696_s3 + $0x28] sm:$0xff]  ;;  %s2602_s0 = sshll.u32 %s4710_s17, 4  ;;  %s2603_s0 = int_to_ptr.hbm [resolvable:$true] %s2602_s0 }
  0x10   :  { %94 = vmatpush.bf16.msra.mxu0 %v86_v6  ;;  %v106_v21 = vld [vmem:[%s4696_s3 + $0x20] sm:$0xff]  ;;  %v108_v23 = vld [vmem:[%s4696_s3 + $0x30] sm:$0xff]  ;;  %v109_v24 = vld [vmem:[%s4696_s3 + $0x38] sm:$0xff] }
  0x11   :  { %v110_v25 = vld [vmem:[%s4696_s3 + $0x40] sm:$0xff]  ;;  %v111_v26 = vld [vmem:[%s4696_s3 + $0x48] sm:$0xff]  ;;  %v112_v27 = vld [vmem:[%s4696_s3 + $0x50] sm:$0xff] }
  0x12   :  { %v113_v28 = vld [vmem:[%s4696_s3 + $0x58] sm:$0xff]  ;;  %v114_v29 = vld [vmem:[%s4696_s3 + $0x60] sm:$0xff]  ;;  %v115_v30 = vld [vmem:[%s4696_s3 + $0x68] sm:$0xff]  ;;  %s3535_s3 = smov 86  }
  0x13   :  { %v3642_v8 = vld [vmem:[%s4716_s30] sm:$0xff]  ;;  %v3647_v9 = vld [vmem:[%s4716_s30 + $0x8] sm:$0xff]  ;;  %v3740_v39 = vld [vmem:[%s4698_s5 + $0x10] sm:$0xff] }
  0x14   :  { %v60_v10 = vpack.c.bf16 %v3647_v9, %v3642_v8  ;;  %95 = vmatpush.bf16.msra.mxu0 %v3262_v7  ;;  %v3726_v33 = vld [vmem:[%s4698_s5] sm:$0xff]  ;;  %v3733_v36 = vld [vmem:[%s4698_s5 + $0x8] sm:$0xff]  ;;  %v3747_v42 = vld [vmem:[%s4698_s5 + $0x18] sm:$0xff] }
  0x15   :  { %v3754_v45 = vld [vmem:[%s4698_s5 + $0x20] sm:$0xff]  ;;  %v3761_v48 = vld [vmem:[%s4698_s5 + $0x28] sm:$0xff]  ;;  %v3768_v51 = vld [vmem:[%s4698_s5 + $0x30] sm:$0xff] }
  0x16   :  { %v3775_v54 = vld [vmem:[%s4698_s5 + $0x38] sm:$0xff]  ;;  %v3782_v57 = vld [vmem:[%s4698_s5 + $0x40] sm:$0xff]  ;;  %v3789_v60 = vld [vmem:[%s4698_s5 + $0x48] sm:$0xff] }
  0x17   :  { %2618 = vmatmul.msk.bf16.vlgmr.msra.gmra.mxu0 %vm77_vm2, %v60_v10  ;;  %v3796_v63 = vld [vmem:[%s4698_s5 + $0x50] sm:$0xff]  ;;  %v3803_v2 = vld [vmem:[%s4698_s5 + $0x58] sm:$0xff]  ;;  %v3810_v6 = vld [vmem:[%s4698_s5 + $0x60] sm:$0xff] }
  0x94   :  { %v97_v11 = vpop.f32.mrf.mxu0 }
  0x95   :  { %v3655_v14 = vadd.f32 %v3434_v12, %v97_v11  ;;  %v3817_v11 = vld [vmem:[%s4698_s5 + $0x68] sm:$0xff]  ;;  %s3539_s5 = smov 8  }
  0x9c   :  { %v99_v13 = vpop.f32.mrf.mxu0 }
  0x9d   :  { %v3657_v15 = vadd.f32 %v3434_v12, %v99_v13 }
  0x9f   :  { %264 = vrot.lane.b32.xlu0 %v3657_v15, %s3534_s21  ;;  %173 = vmatpush.msra.mxu1 %v3657_v15  ;;  %v3429_v17 = vpack.i.bf16 %v3655_v14, %v3657_v15 }
  0xa1   :  { %174 = vmatpush.msra.mxu1 %v3655_v14 }
  0xa2   :  { %2619 = vmatmul.msk.f32.vlgmr.msra.gmra.mxu1 %vm116_vm3, %v102_v16  ;;  %v246_v16 = vld [vmem:[%s4699_s6] sm:$0xff] }
  0xa7   :  { %262 = vrot.lane.b32.xlu0 %v3655_v14, %s3534_s21 }
  0xaa   :  { %2620 = vmatmul.msk.f32.gmra.mxu1 %vm116_vm3, %v103_v18 }
  0xb2   :  { %2621 = vmatmul.msk.f32.gmra.mxu1 %vm116_vm3, %v104_v19 }
  0xba   :  { %2622 = vmatmul.msk.f32.gmra.mxu1 %vm116_vm3, %v105_v20 }
  0xc2   :  { %2623 = vmatmul.msk.f32.gmra.mxu1 %vm116_vm3, %v106_v21  ;;  %v247_v21 = vld [vmem:[%s4699_s6 + $0x8] sm:$0xff] }
  0xca   :  { %2624 = vmatmul.msk.f32.gmra.mxu1 %vm116_vm3, %v107_v22 }
  0xd2   :  { %2625 = vmatmul.msk.f32.gmra.mxu1 %vm116_vm3, %v108_v23 }
  0xda   :  { %2626 = vmatmul.msk.f32.gmra.mxu1 %vm116_vm3, %v109_v24 }
  0xe2   :  { %2627 = vmatmul.msk.f32.gmra.mxu1 %vm116_vm3, %v110_v25  ;;  %v248_v25 = vld [vmem:[%s4699_s6 + $0x10] sm:$0xff] }
  0xea   :  { %2628 = vmatmul.msk.f32.gmra.mxu1 %vm116_vm3, %v111_v26 }
  0xf2   :  { %2629 = vmatmul.msk.f32.gmra.mxu1 %vm116_vm3, %v112_v27 }
  0xfa   :  { %2630 = vmatmul.msk.f32.gmra.mxu1 %vm116_vm3, %v113_v28 }
 0x102   :  { %2631 = vmatmul.msk.f32.gmra.mxu1 %vm116_vm3, %v114_v29  ;;  %v249_v29 = vld [vmem:[%s4699_s6 + $0x18] sm:$0xff] }
 0x10a   :  { %2632 = vmatmul.msk.f32.gmra.mxu1 %vm116_vm3, %v115_v30 }
 0x111   :  { %v265_v31 = vpop.permute.xlu0 %264 }
 0x112   :  { %2633 = vmatpush.xpose.msk.msra.mxu2 %vm77_vm2, %v265_v31 }
 0x119   :  { %v263_v32 = vpop.permute.xlu0 %262 }
 0x11a   :  { %2634 = vmatpush.xpose.msk.msra.mxu2 %vm77_vm2, %v263_v32 }
 0x11f   :  { %v176_v34 = vpop.f32.mrf.mxu1 }
 0x120   :  { %v232_v35 = vmul.f32 %v3726_v33, %v176_v34  ;;  %v250_v34 = vld [vmem:[%s4699_s6 + $0x20] sm:$0xff] }
 0x122   :  { %2635 = vmatmul.msk.f32.vlgmr.msra.gmra.mxu2 %vm77_vm2, %v232_v35 }
 0x127   :  { %v179_v37 = vpop.f32.mrf.mxu1 }
 0x128   :  { %v233_v38 = vmul.f32 %v3733_v36, %v179_v37 }
 0x12a   :  { %2636 = vmatmul.msk.f32.gmra.mxu2 %vm77_vm2, %v233_v38 }
 0x12f   :  { %v182_v40 = vpop.f32.mrf.mxu1 }
 0x130   :  { %v234_v41 = vmul.f32 %v3740_v39, %v182_v40  ;;  %v251_v40 = vld [vmem:[%s4699_s6 + $0x28] sm:$0xff] }
 0x132   :  { %2637 = vmatmul.msk.f32.gmra.mxu2 %vm77_vm2, %v234_v41 }
 0x137   :  { %v185_v43 = vpop.f32.mrf.mxu1 }
 0x138   :  { %v235_v44 = vmul.f32 %v3747_v42, %v185_v43 }
 0x13a   :  { %2638 = vmatmul.msk.f32.gmra.mxu2 %vm77_vm2, %v235_v44 }
 0x13f   :  { %v188_v46 = vpop.f32.mrf.mxu1 }
 0x140   :  { %v236_v47 = vmul.f32 %v3754_v45, %v188_v46  ;;  %v252_v46 = vld [vmem:[%s4699_s6 + $0x30] sm:$0xff] }
 0x142   :  { %2639 = vmatmul.msk.f32.gmra.mxu2 %vm77_vm2, %v236_v47 }
 0x147   :  { %v191_v49 = vpop.f32.mrf.mxu1 }
 0x148   :  { %v237_v50 = vmul.f32 %v3761_v48, %v191_v49 }
 0x14a   :  { %2640 = vmatmul.msk.f32.gmra.mxu2 %vm77_vm2, %v237_v50 }
 0x14f   :  { %v194_v52 = vpop.f32.mrf.mxu1 }
 0x150   :  { %v238_v53 = vmul.f32 %v3768_v51, %v194_v52  ;;  %v253_v52 = vld [vmem:[%s4699_s6 + $0x38] sm:$0xff] }
 0x152   :  { %2641 = vmatmul.msk.f32.gmra.mxu2 %vm77_vm2, %v238_v53 }
 0x157   :  { %v197_v55 = vpop.f32.mrf.mxu1 }
 0x158   :  { %v239_v56 = vmul.f32 %v3775_v54, %v197_v55 }
 0x15a   :  { %2642 = vmatmul.msk.f32.gmra.mxu2 %vm77_vm2, %v239_v56 }
 0x15f   :  { %v200_v58 = vpop.f32.mrf.mxu1 }
 0x160   :  { %v240_v59 = vmul.f32 %v3782_v57, %v200_v58  ;;  %v254_v58 = vld [vmem:[%s4699_s6 + $0x40] sm:$0xff] }
 0x162   :  { %2643 = vmatmul.msk.f32.gmra.mxu2 %vm77_vm2, %v240_v59 }
 0x167   :  { %v203_v61 = vpop.f32.mrf.mxu1 }
 0x168   :  { %v241_v62 = vmul.f32 %v3789_v60, %v203_v61 }
 0x16a   :  { %2644 = vmatmul.msk.f32.gmra.mxu2 %vm77_vm2, %v241_v62 }
 0x16f   :  { %v206_v0 = vpop.f32.mrf.mxu1 }
 0x170   :  { %v242_v1 = vmul.f32 %v3796_v63, %v206_v0 }
 0x172   :  { %2645 = vmatmul.msk.f32.gmra.mxu2 %vm77_vm2, %v242_v1  ;;  %v256_v1 = vld [vmem:[%s4699_s6 + $0x50] sm:$0xff] }
 0x177   :  { %v209_v3 = vpop.f32.mrf.mxu1 }
 0x178   :  { %v243_v5 = vmul.f32 %v3803_v2, %v209_v3 }
 0x17a   :  { %2646 = vmatmul.msk.f32.gmra.mxu2 %vm77_vm2, %v243_v5 }
 0x17f   :  { %v212_v7 = vpop.f32.mrf.mxu1 }
 0x180   :  { %v244_v10 = vmul.f32 %v3810_v6, %v212_v7 }
 0x182   :  { %2647 = vmatmul.msk.f32.gmra.mxu2 %vm77_vm2, %v244_v10  ;;  %v257_v10 = vld [vmem:[%s4699_s6 + $0x58] sm:$0xff] }
 0x187   :  { %v215_v12 = vpop.f32.mrf.mxu1 }
 0x188   :  { %v245_v13 = vmul.f32 %v3817_v11, %v215_v12 }
 0x18a   :  { %2648 = vmatmul.msk.f32.gmra.mxu2 %vm77_vm2, %v245_v13 }
 0x1a5   :  { %v329_v18 = vpop.f32.mrf.mxu2 }
 0x1a6   :  { %v3824_v19 = vadd.f32 %v329_v18, %v246_v16  ;;  %v258_v18 = vld [vmem:[%s4699_s6 + $0x60] sm:$0xff] }
 0x1a8   :  { %v371_v20 = vsel %vm116_vm3, %v3824_v19, -inf }
 0x1a9   :  { %372 = vmax.xlane.f32.xlu1 %v371_v20 }
 0x1ad   :  { %v332_v22 = vpop.f32.mrf.mxu2 }
 0x1ae   :  { %v3831_v23 = vadd.f32 %v332_v22, %v247_v21 }
 0x1b0   :  { %v374_v24 = vsel %vm116_vm3, %v3831_v23, -inf }
 0x1b1   :  { %375 = vmax.xlane.f32.xlu1 %v374_v24  ;;  %v259_v24 = vld [vmem:[%s4699_s6 + $0x68] sm:$0xff] }
 0x1b5   :  { %v335_v26 = vpop.f32.mrf.mxu2 }
 0x1b6   :  { %v3838_v27 = vadd.f32 %v335_v26, %v248_v25 }
 0x1b8   :  { %v377_v28 = vsel %vm116_vm3, %v3838_v27, -inf }
 0x1b9   :  { %378 = vmax.xlane.f32.xlu2 %v377_v28 }
 0x1bd   :  { %v338_v30 = vpop.f32.mrf.mxu2 }
 0x1be   :  { %v3845_v31 = vadd.f32 %v338_v30, %v249_v29 }
 0x1c0   :  { %v380_v32 = vsel %vm116_vm3, %v3845_v31, -inf }
 0x1c1   :  { %381 = vmax.xlane.f32.xlu2 %v380_v32 }
 0x1c5   :  { %v341_v35 = vpop.f32.mrf.mxu2 }
 0x1c6   :  { %v3852_v37 = vadd.f32 %v341_v35, %v250_v34 }
 0x1c8   :  { %v383_v38 = vsel %vm116_vm3, %v3852_v37, -inf }
 0x1c9   :  { %384 = vmax.xlane.f32.xlu0 %v383_v38 }
 0x1cd   :  { %v344_v41 = vpop.f32.mrf.mxu2 }
 0x1ce   :  { %v3859_v43 = vadd.f32 %v344_v41, %v251_v40 }
 0x1d0   :  { %v386_v44 = vsel %vm116_vm3, %v3859_v43, -inf }
 0x1d1   :  { %387 = vmax.xlane.f32.xlu1 %v386_v44 }
 0x1d5   :  { %v347_v47 = vpop.f32.mrf.mxu2 }
 0x1d6   :  { %v3866_v49 = vadd.f32 %v347_v47, %v252_v46 }
 0x1d8   :  { %v389_v50 = vsel %vm116_vm3, %v3866_v49, -inf }
 0x1d9   :  { %390 = vmax.xlane.f32.xlu2 %v389_v50 }
 0x1dd   :  { %v350_v53 = vpop.f32.mrf.mxu2 }
 0x1de   :  { %v3873_v55 = vadd.f32 %v350_v53, %v253_v52  ;;  %v255_v52 = vld [vmem:[%s4699_s6 + $0x48] sm:$0xff] }
 0x1e0   :  { %v392_v56 = vsel %vm116_vm3, %v3873_v55, -inf }
 0x1e1   :  { %393 = vmax.xlane.f32.xlu2 %v392_v56 }
 0x1e5   :  { %v353_v59 = vpop.f32.mrf.mxu2 }
 0x1e6   :  { %v3880_v61 = vadd.f32 %v353_v59, %v254_v58 }
 0x1e8   :  { %v395_v62 = vsel %vm116_vm3, %v3880_v61, -inf }
 0x1e9   :  { %396 = vmax.xlane.f32.xlu2 %v395_v62 }
 0x1ed   :  { %v356_v0 = vpop.f32.mrf.mxu2 }
 0x1ee   :  { %v3930_v56 = vadd.f32 %v356_v0, %v255_v52 }
 0x1f0   :  { %v398_v59 = vsel %vm116_vm3, %v3930_v56, -inf }
 0x1f5   :  { %v359_v3 = vpop.f32.mrf.mxu2 }
 0x1f6   :  { %v3887_v5 = vadd.f32 %v359_v3, %v256_v1 }
 0x1f8   :  { %v401_v7 = vsel %vm116_vm3, %v3887_v5, -inf }
 0x1f9   :  { %402 = vmax.xlane.f32.xlu0 %v401_v7 }
 0x1fd   :  { %v362_v12 = vpop.f32.mrf.mxu2 }
 0x1fe   :  { %v3894_v13 = vadd.f32 %v362_v12, %v257_v10 }
 0x200   :  { %v404_v16 = vsel %vm116_vm3, %v3894_v13, -inf }
 0x201   :  { %405 = vmax.xlane.f32.xlu0 %v404_v16 }
 0x205   :  { %v365_v20 = vpop.f32.mrf.mxu2 }
 0x206   :  { %v3901_v21 = vadd.f32 %v365_v20, %v258_v18 }
 0x208   :  { %v407_v22 = vsel %vm116_vm3, %v3901_v21, -inf }
 0x209   :  { %408 = vmax.xlane.f32.xlu0 %v407_v22 }
 0x20d   :  { %v368_v25 = vpop.f32.mrf.mxu2 }
 0x20e   :  { %v3908_v26 = vadd.f32 %v368_v25, %v259_v24 }
 0x210   :  { %v410_v28 = vsel %vm116_vm3, %v3908_v26, -inf }
 0x211   :  { %411 = vmax.xlane.f32.xlu0 %v410_v28 }
 0x21c   :  { %v373_v29 = vpop.xlane.xlu1 %372 }
 0x21d   :  { %v413_v30 = vsub.f32 %v3824_v19, %v373_v29 }
 0x21f   :  { %v427_v32 = vmul.f32 1.442695, %v413_v30 }
 0x221   :  { %3441 = vpow2.f32 %v427_v32 }
 0x224   :  { %v376_v34 = vpop.xlane.xlu1 %375 }
 0x225   :  { %v414_v35 = vsub.f32 %v3831_v23, %v376_v34 }
 0x227   :  { %v3914_v38 = vpop.eup %3441  ;;  %v429_v40 = vmul.f32 1.442695, %v414_v35 }
 0x228   :  { %v455_v41 = vsel %vm116_vm3, %v3914_v38, 0.0 }
 0x229   :  { %3443 = vpow2.f32 %v429_v40  ;;  %456 = vadd.xlane.f32.xlu1 %v455_v41 }
 0x22c   :  { %v379_v44 = vpop.xlane.xlu2 %378 }
 0x22d   :  { %v415_v46 = vsub.f32 %v3838_v27, %v379_v44 }
 0x22f   :  { %v3919_v47 = vpop.eup %3443  ;;  %v431_v50 = vmul.f32 1.442695, %v415_v46 }
 0x230   :  { %v458_v19 = vsel %vm116_vm3, %v3919_v47, 0.0 }
 0x231   :  { %3445 = vpow2.f32 %v431_v50  ;;  %459 = vadd.xlane.f32.xlu2 %v458_v19 }
 0x234   :  { %v382_v1 = vpop.xlane.xlu2 %381 }
 0x237   :  { %v3923_v23 = vpop.eup %3445 }
 0x238   :  { %v461_v53 = vsel %vm116_vm3, %v3923_v23, 0.0 }
 0x239   :  { %462 = vadd.xlane.f32.xlu2 %v461_v53 }
 0x23c   :  { %v385_v27 = vpop.xlane.xlu0 %384 }
 0x23d   :  { %v417_v58 = vsub.f32 %v3852_v37, %v385_v27 }
 0x23f   :  { %v435_v62 = vmul.f32 1.442695, %v417_v58 }
 0x241   :  { %3447 = vpow2.f32 %v435_v62  ;;  %399 = vmax.xlane.f32.xlu2 %v398_v59 }
 0x242   :  { %3430 = vrot.lane.b32.xlu1 %v3429_v17, %s3535_s3 }
 0x244   :  { %v388_v3 = vpop.xlane.xlu1 %387 }
 0x245   :  { %v418_v7 = vsub.f32 %v3859_v43, %v388_v3 }
 0x247   :  { %v3939_v0 = vpop.eup %3447  ;;  %v437_v10 = vmul.f32 1.442695, %v418_v7 }
 0x248   :  { %v467_v37 = vsel %vm116_vm3, %v3939_v0, 0.0 }
 0x249   :  { %3449 = vpow2.f32 %v437_v10  ;;  %468 = vadd.xlane.f32.xlu2 %v467_v37 }
 0x24c   :  { %v391_v12 = vpop.xlane.xlu2 %390 }
 0x24d   :  { %v419_v16 = vsub.f32 %v3866_v49, %v391_v12  ;;  %v416_v49 = vsub.f32 %v3845_v31, %v382_v1 }
 0x24f   :  { %v3944_v18 = vpop.eup %3449  ;;  %v439_v20 = vmul.f32 1.442695, %v419_v16  ;;  %v433_v29 = vmul.f32 1.442695, %v416_v49 }
 0x250   :  { %v470_v14 = vsel %vm116_vm3, %v3944_v18, 0.0 }
 0x251   :  { %3451 = vpow2.f32 %v439_v20  ;;  %471 = vadd.xlane.f32.xlu2 %v470_v14 }
 0x254   :  { %v394_v15 = vpop.xlane.xlu2 %393 }
 0x255   :  { %v420_v17 = vsub.f32 %v3873_v55, %v394_v15 }
 0x257   :  { %v3949_v43 = vpop.eup %3451  ;;  %v441_v22 = vmul.f32 1.442695, %v420_v17 }
 0x258   :  { %v473_v24 = vsel %vm116_vm3, %v3949_v43, 0.0 }
 0x259   :  { %3453 = vpow2.f32 %v441_v22  ;;  %474 = vadd.xlane.f32.xlu2 %v473_v24 }
 0x25c   :  { %v397_v25 = vpop.xlane.xlu2 %396 }
 0x25d   :  { %v421_v28 = vsub.f32 %v3880_v61, %v397_v25 }
 0x25f   :  { %v3955_v30 = vpop.eup %3453  ;;  %v443_v32 = vmul.f32 1.442695, %v421_v28 }
 0x260   :  { %v476_v55 = vsel %vm116_vm3, %v3955_v30, 0.0 }
 0x261   :  { %3455 = vpow2.f32 %v443_v32  ;;  %477 = vadd.xlane.f32.xlu2 %v476_v55 }
 0x262   :  { %3457 = vpow2.f32 %v433_v29 }
 0x267   :  { %v3959_v34 = vpop.eup %3455 }
 0x268   :  { %v3961_v35 = vpop.eup %3457  ;;  %v479_v31 = vsel %vm116_vm3, %v3959_v34, 0.0 }
 0x269   :  { %480 = vadd.xlane.f32.xlu0 %v479_v31  ;;  %v464_v61 = vsel %vm116_vm3, %v3961_v35, 0.0 }
 0x26c   :  { %465 = vadd.xlane.f32.xlu1 %v464_v61  ;;  %v403_v40 = vpop.xlane.xlu0 %402 }
 0x26d   :  { %v423_v41 = vsub.f32 %v3887_v5, %v403_v40 }
 0x26f   :  { %v447_v44 = vmul.f32 1.442695, %v423_v41 }
 0x271   :  { %3459 = vpow2.f32 %v447_v44 }
 0x274   :  { %v406_v46 = vpop.xlane.xlu0 %405 }
 0x275   :  { %v424_v50 = vsub.f32 %v3894_v13, %v406_v46 }
 0x277   :  { %v3969_v19 = vpop.eup %3459  ;;  %v449_v52 = vmul.f32 1.442695, %v424_v50 }
 0x278   :  { %v485_v53 = vsel %vm116_vm3, %v3969_v19, 0.0 }
 0x279   :  { %3461 = vpow2.f32 %v449_v52  ;;  %486 = vadd.xlane.f32.xlu0 %v485_v53 }
 0x27c   :  { %v409_v27 = vpop.xlane.xlu0 %408 }
 0x27f   :  { %v3973_v58 = vpop.eup %3461 }
 0x280   :  { %v488_v59 = vsel %vm116_vm3, %v3973_v58, 0.0 }
 0x281   :  { %489 = vadd.xlane.f32.xlu1 %v488_v59 }
 0x284   :  { %v412_v5 = vpop.xlane.xlu0 %411 }
 0x285   :  { %v426_v62 = vsub.f32 %v3908_v26, %v412_v5  ;;  %v425_v26 = vsub.f32 %v3901_v21, %v409_v27 }
 0x287   :  { %v453_v1 = vmul.f32 1.442695, %v426_v62  ;;  %v451_v49 = vmul.f32 1.442695, %v425_v26 }
 0x289   :  { %3463 = vpow2.f32 %v453_v1 }
 0x28f   :  { %v3978_v13 = vpop.eup %3463 }
 0x290   :  { %v494_v3 = vsel %vm116_vm3, %v3978_v13, 0.0 }
 0x291   :  { %495 = vadd.xlane.f32.xlu0 %v494_v3 }
 0x29c   :  { %v457_v10 = vpop.xlane.xlu1 %456 }
 0x29d   :  { %3465 = vrcp.f32 %v457_v10 }
 0x2a3   :  { %v3466_v20 = vpop.eup %3465 }
 0x2a4   :  { %v460_v7 = vpop.xlane.xlu2 %459  ;;  %v511_v24 = vmul.f32 %v3466_v20, %v3914_v38 }
 0x2a5   :  { %3467 = vrcp.f32 %v460_v7 }
 0x2ab   :  { %v3468_v25 = vpop.eup %3467 }
 0x2ac   :  { %v463_v37 = vpop.xlane.xlu2 %462  ;;  %v512_v29 = vmul.f32 %v3468_v25, %v3919_v47 }
 0x2b4   :  { %v3431_v12 = vpop.permute.xlu1 %3430  ;;  %v400_v16 = vpop.xlane.xlu2 %399 }
 0x2b5   :  { %v422_v14 = vsub.f32 %v3930_v56, %v400_v16  ;;  %v3432_v15 = vunpack.i.l.bf16 %v3431_v12  ;;  %v3433_v22 = vunpack.i.h.bf16 %v3431_v12 }
 0x2b7   :  { %v445_v17 = vmul.f32 1.442695, %v422_v14  ;;  %587 = vmatpush.msra.mxu3 %v3432_v15 }
 0x2b9   :  { %3469 = vpow2.f32 %v445_v17  ;;  %588 = vmatpush.msra.mxu3 %v3433_v22 }
 0x2ba   :  { %2649 = vmatmul.msk.f32.vlgmr.msra.gmra.mxu3 %vm116_vm3, %v511_v24  ;;  %3471 = vpow2.f32 %v451_v49 }
 0x2bb   :  { %3473 = vrcp.f32 %v463_v37 }
 0x2bc   :  { %v469_v31 = vpop.xlane.xlu2 %468 }
 0x2bf   :  { %v3470_v28 = vpop.eup %3469 }
 0x2c0   :  { %v482_v56 = vsel %vm116_vm3, %v3470_v28, 0.0  ;;  %v3472_v21 = vpop.eup %3471 }
 0x2c1   :  { %483 = vadd.xlane.f32.xlu2 %v482_v56  ;;  %v3474_v32 = vpop.eup %3473  ;;  %v491_v38 = vsel %vm116_vm3, %v3472_v21, 0.0 }
 0x2c2   :  { %2650 = vmatmul.msk.f32.gmra.mxu3 %vm116_vm3, %v512_v29  ;;  %v513_v55 = vmul.f32 %v3474_v32, %v3923_v23 }
 0x2c4   :  { %v472_v41 = vpop.xlane.xlu2 %471 }
 0x2c9   :  { %492 = vadd.xlane.f32.xlu2 %v491_v38 }
 0x2ca   :  { %2651 = vmatmul.msk.f32.gmra.mxu3 %vm116_vm3, %v513_v55 }
 0x2cc   :  { %v475_v50 = vpop.xlane.xlu2 %474 }
 0x2d4   :  { %v478_v53 = vpop.xlane.xlu2 %477 }
 0x2dc   :  { %v481_v59 = vpop.xlane.xlu0 %480 }
 0x2df   :  { %v466_v61 = vpop.xlane.xlu1 %465 }
 0x2e0   :  { %3475 = vrcp.f32 %v466_v61 }
 0x2e1   :  { %3477 = vrcp.f32 %v469_v31 }
 0x2e2   :  { %3479 = vrcp.f32 %v472_v41 }
 0x2e3   :  { %3481 = vrcp.f32 %v475_v50 }
 0x2e4   :  { %3483 = vrcp.f32 %v478_v53  ;;  %v3435_v53 = vld [vmem:[%s4701_s8] ss:$0 sm:$0xff] }
 0x2e5   :  { %3485 = vrcp.f32 %v481_v59 }
 0x2e6   :  { %v3476_v40 = vpop.eup %3475 }
 0x2e7   :  { %v514_v47 = vmul.f32 %v3476_v40, %v3961_v35  ;;  %v3478_v44 = vpop.eup %3477 }
 0x2e8   :  { %v515_v46 = vmul.f32 %v3478_v44, %v3939_v0  ;;  %v3480_v23 = vpop.eup %3479 }
 0x2e9   :  { %2652 = vmatmul.msk.f32.gmra.mxu3 %vm116_vm3, %v514_v47  ;;  %v516_v52 = vmul.f32 %v3480_v23, %v3944_v18  ;;  %v3482_v27 = vpop.eup %3481 }
 0x2ea   :  { %v517_v35 = vmul.f32 %v3482_v27, %v3949_v43  ;;  %v3484_v5 = vpop.eup %3483 }
 0x2eb   :  { %v518_v0 = vmul.f32 %v3484_v5, %v3955_v30  ;;  %v3486_v62 = vpop.eup %3485 }
 0x2ec   :  { %v519_v1 = vmul.f32 %v3486_v62, %v3959_v34  ;;  %v487_v3 = vpop.xlane.xlu0 %486 }
 0x2f1   :  { %2653 = vmatmul.msk.f32.gmra.mxu3 %vm116_vm3, %v515_v46 }
 0x2f4   :  { %v490_v10 = vpop.xlane.xlu1 %489 }
 0x2f9   :  { %2654 = vmatmul.msk.f32.gmra.mxu3 %vm116_vm3, %v516_v52 }
 0x301   :  { %2655 = vmatmul.msk.f32.gmra.mxu3 %vm116_vm3, %v517_v35 }
 0x304   :  { %v496_v20 = vpop.xlane.xlu0 %495 }
 0x309   :  { %2656 = vmatmul.msk.f32.gmra.mxu3 %vm116_vm3, %v518_v0 }
 0x311   :  { %2657 = vmatmul.msk.f32.gmra.mxu3 %vm116_vm3, %v519_v1 }
 0x334   :  { %v484_v18 = vpop.xlane.xlu2 %483 }
 0x335   :  { %3487 = vrcp.f32 %v484_v18 }
 0x336   :  { %3489 = vrcp.f32 %v487_v3  ;;  %v3536_v3 = vmov 21.0  }
 0x337   :  { %3491 = vrcp.f32 %v490_v10 }
 0x33b   :  { %v3488_v7 = vpop.eup %3487 }
 0x33c   :  { %v520_v43 = vmul.f32 %v3488_v7, %v3470_v28  ;;  %v3490_v37 = vpop.eup %3489  ;;  %v493_v12 = vpop.xlane.xlu2 %492 }
 0x33d   :  { %v521_v30 = vmul.f32 %v3490_v37, %v3969_v19  ;;  %v3492_v16 = vpop.eup %3491  ;;  %3493 = vrcp.f32 %v493_v12  ;;  %v590_v19 = vpop.f32.mrf.mxu3 }
 0x33e   :  { %2658 = vmatmul.msk.f32.gmra.mxu3 %vm116_vm3, %v520_v43  ;;  %v522_v34 = vmul.f32 %v3492_v16, %v3973_v58  ;;  %3495 = vrcp.f32 %v496_v20  ;;  %v632_v50 = vmul.f32 %v590_v19, %v3726_v33  ;;  %v3263_v33 = vld [vmem:[%s4700_s7] sm:$0xff] }
 0x33f   :  { %3497 = vrcp.f32 %v3536_v3  ;;  %v2704_v3 = vld [vmem:[%s4704_s11 + $0x20] sm:$0xf] }
 0x343   :  { %v3494_v14 = vpop.eup %3493 }
 0x344   :  { %v523_v15 = vmul.f32 %v3494_v14, %v3472_v21  ;;  %v3496_v26 = vpop.eup %3495 }
 0x345   :  { %v524_v17 = vmul.f32 %v3496_v26, %v3978_v13  ;;  %v593_v22 = vpop.f32.mrf.mxu3  ;;  %v3498_v7 = vpop.eup %3497 }
 0x346   :  { %2659 = vmatmul.msk.f32.gmra.mxu3 %vm116_vm3, %v521_v30  ;;  %v726_v43 = vmul.f32 21.0, %v3498_v7  ;;  %vm730_vm5 = vweird.f32 %v3498_v7 }
 0x348   :  { %v727_v10 = vsub.f32 1.0, %v726_v43 }
 0x34a   :  { %v728_v37 = vmul.f32 %v3498_v7, %v727_v10  ;;  %v3276_v10 = vld [vmem:[%s4704_s11 + $0x5c] sm:$0xf0] }
 0x34c   :  { %v729_v30 = vadd.f32 %v3498_v7, %v728_v37  ;;  %v3268_v37 = vld [vmem:[%s4704_s11 + $0x24] sm:$0xf] }
 0x34d   :  { %v596_v24 = vpop.f32.mrf.mxu3 }
 0x34e   :  { %2660 = vmatmul.msk.f32.gmra.mxu3 %vm116_vm3, %v522_v34  ;;  %v4047_v12 = vsel %vm730_vm5, %v3498_v7, %v729_v30  ;;  %v2706_v30 = vld [vmem:[%s4704_s11 + $0x60] sm:$0xf0] }
 0x356   :  { %2661 = vmatmul.msk.f32.gmra.mxu3 %vm116_vm3, %v523_v15 }
 0x35e   :  { %2662 = vmatmul.msk.f32.gmra.mxu3 %vm116_vm3, %v524_v17 }
 0x36c   :  { %v599_v49 = vpop.f32.mrf.mxu3 }
 0x374   :  { %v602_v25 = vpop.f32.mrf.mxu3 }
 0x37c   :  { %v605_v28 = vpop.f32.mrf.mxu3 }
 0x384   :  { %v608_v58 = vpop.f32.mrf.mxu3 }
 0x38c   :  { %v611_v56 = vpop.f32.mrf.mxu3 }
 0x394   :  { %v614_v29 = vpop.f32.mrf.mxu3 }
 0x395   :  { %v640_v44 = vmul.f32 %v614_v29, %v3782_v57  ;;  %v636_v57 = vmul.f32 %v602_v25, %v3754_v45  ;;  %v646_v45 = vld [vmem:[%s4697_s4] sm:$0xff] }
 0x3c1   :  { %v617_v32 = vpop.f32.mrf.mxu3 }
 0x3c2   :  { %v641_v47 = vmul.f32 %v617_v32, %v3789_v60  ;;  %v637_v60 = vmul.f32 %v605_v28, %v3761_v48  ;;  %v633_v48 = vmul.f32 %v593_v22, %v3733_v36  ;;  %v797_v22 = vld [vmem:[%s4704_s11 + $0x80] sm:$0x77] }
 0x3c3   :  { %v897_v25 = vunpack.c.l.b16 %v797_v22 }
 0x3c5   :  { %v929_v29 = vpack.c.b16 %v897_v25, %v897_v25 }
 0x3c9   :  { %v620_v38 = vpop.f32.mrf.mxu3 }
 0x3ca   :  { %v642_v41 = vmul.f32 %v620_v38, %v3796_v63  ;;  %v681_v63 = vld [vmem:[%s4700_s7 + $0x8] sm:$0x7] }
 0x3d1   :  { %v623_v55 = vpop.f32.mrf.mxu3 }
 0x3d2   :  { %v643_v40 = vmul.f32 %v623_v55, %v3803_v2  ;;  %v638_v2 = vmul.f32 %v608_v58, %v3768_v51  ;;  %v634_v51 = vmul.f32 %v596_v24, %v3740_v39  ;;  %v647_v39 = vld [vmem:[%s4697_s4 + $0x8] sm:$0xff]  ;;  %v799_v24 = vld [vmem:[%s4704_s11 + $0x90] sm:$0x77] }
 0x3d3   :  { %v901_v28 = vunpack.c.l.b16 %v799_v24  ;;  %v902_v58 = vunpack.c.h.b16 %v799_v24 }
 0x3d5   :  { %v933_v32 = vpack.c.b16 %v901_v28, %v901_v28  ;;  %v934_v38 = vpack.c.b16 %v902_v58, %v902_v58 }
 0x3d9   :  { %v626_v21 = vpop.f32.mrf.mxu3 }
 0x3da   :  { %v644_v13 = vmul.f32 %v626_v21, %v3810_v6  ;;  %v639_v6 = vmul.f32 %v611_v56, %v3775_v54  ;;  %v635_v54 = vmul.f32 %v599_v49, %v3747_v42  ;;  %v4070_v49 = vld [vmem:[%s4704_s11 + $0x98] sm:$0x77]  ;;  %v965_v21 = vand.u32 %v929_v29, %v3633_v4 }
 0x3db   :  { %v903_v56 = vunpack.c.l.b16 %v4070_v49 }
 0x3dd   :  { %v935_v55 = vpack.c.b16 %v903_v56, %v903_v56 }
 0x3e1   :  { %v629_v31 = vpop.f32.mrf.mxu3 }
 0x3e2   :  { %v645_v61 = vmul.f32 %v629_v31, %v3817_v11  ;;  %v691_v11 = vunpack.c.l.b16 %v681_v63  ;;  %v977_v31 = vand.u32 %v933_v32, %v3633_v4  ;;  %v3274_v63 = vld [vmem:[%s4704_s11 + $0x4c] sm:$0xf0] }
 0x3e4   :  { %657 = vmatpush.msrb.mxu0 %v645_v61  ;;  %3408 = vmatpush.msrb.mxu1 %v645_v61  ;;  %v693_v46 = vpack.c.b16 %v691_v11, %v691_v11  ;;  %v980_v61 = vand.u32 %v934_v38, %v3633_v4 }
 0x3e6   :  { %658 = vmatpush.msrb.mxu0 %v644_v13  ;;  %3409 = vmatpush.msrb.mxu1 %v644_v13  ;;  %v699_v42 = vand.u32 %v693_v46, %v3633_v4  ;;  %v983_v13 = vand.u32 %v935_v55, %v3633_v4  ;;  %v2696_v46 = vld [vmem:[%s4704_s11 + $0x18] sm:$0xf] }
 0x3e7   :  { %1088 = vmatpush.bf16.msrb.mxu3 %v980_v61  ;;  %v803_v61 = vld [vmem:[%s4704_s11 + $0xb0] sm:$0x77] }
 0x3e8   :  { %659 = vmatpush.msrb.mxu0 %v643_v40  ;;  %3410 = vmatpush.msrb.mxu1 %v643_v40 }
 0x3e9   :  { %1102 = vmatpush.bf16.msrb.mxu2 %v983_v13  ;;  %v3436_v13 = vld [vmem:[%s4702_s9] ss:$0 sm:$0xff] }
 0x3ea   :  { %660 = vmatpush.msrb.mxu0 %v642_v41  ;;  %3411 = vmatpush.msrb.mxu1 %v642_v41 }
 0x3ec   :  { %661 = vmatpush.msrb.mxu0 %v641_v47  ;;  %3412 = vmatpush.msrb.mxu1 %v641_v47  ;;  %v2672_v47 = vld [vmem:[%s4704_s11] sm:$0xf] }
 0x3ee   :  { %662 = vmatpush.msrb.mxu0 %v640_v44  ;;  %3413 = vmatpush.msrb.mxu1 %v640_v44  ;;  %v3272_v44 = vld [vmem:[%s4704_s11 + $0x3c] sm:$0xf0] }
 0x3f0   :  { %663 = vmatpush.msrb.mxu0 %v639_v6  ;;  %3414 = vmatpush.msrb.mxu1 %v639_v6  ;;  %v2688_v6 = vld [vmem:[%s4704_s11 + $0x10] sm:$0xf] }
 0x3f2   :  { %664 = vmatpush.msrb.mxu0 %v638_v2  ;;  %3415 = vmatpush.msrb.mxu1 %v638_v2  ;;  %v2673_v2 = vor.u32 %v3272_v44, %v2672_v47 }
 0x3f4   :  { %665 = vmatpush.msrb.mxu0 %v637_v60  ;;  %3416 = vmatpush.msrb.mxu1 %v637_v60  ;;  %v3266_v60 = vld [vmem:[%s4704_s11 + $0x14] sm:$0xf] }
 0x3f6   :  { %666 = vmatpush.msrb.mxu0 %v636_v57  ;;  %3417 = vmatpush.msrb.mxu1 %v636_v57  ;;  %v2690_v57 = vld [vmem:[%s4704_s11 + $0x50] sm:$0xf0] }
 0x3f8   :  { %667 = vmatpush.msrb.mxu0 %v635_v54  ;;  %3418 = vmatpush.msrb.mxu1 %v635_v54  ;;  %v2689_v54 = vor.u32 %v3274_v63, %v2688_v6  ;;  %v909_v6 = vunpack.c.l.b16 %v803_v61  ;;  %v910_v63 = vunpack.c.h.b16 %v803_v61  ;;  %v3271_v61 = vld [vmem:[%s4704_s11 + $0x3c] sm:$0xf] }
 0x3fa   :  { %668 = vmatpush.msrb.mxu0 %v634_v51  ;;  %3419 = vmatpush.msrb.mxu1 %v634_v51  ;;  %v2693_v51 = vor.u32 %v3266_v60, %v2690_v57  ;;  %v3437_v57 = vld [vmem:[%s4703_s10] ss:$0 sm:$0xff] }
 0x3fc   :  { %669 = vmatpush.msrb.mxu0 %v633_v48  ;;  %3420 = vmatpush.msrb.mxu1 %v633_v48  ;;  %v3275_v48 = vld [vmem:[%s4704_s11 + $0x54] sm:$0xf0] }
 0x3fd   :  { %1089 = vmatpush.bf16.msrb.mxu3 %v2693_v51 }
 0x3fe   :  { %670 = vmatpush.msrb.mxu0 %v632_v50  ;;  %3421 = vmatpush.msrb.mxu1 %v632_v50  ;;  %v2697_v50 = vor.u32 %v3275_v48, %v2696_v46  ;;  %v941_v46 = vpack.c.b16 %v909_v6, %v909_v6  ;;  %v942_v48 = vpack.c.b16 %v910_v63, %v910_v63  ;;  %v3303_v6 = vld [vmem:[%s4706_s13 + $0xb8] sm:$0xff]  ;;  %v3281_v63 = vld [vmem:[%s4706_s13 + $0x8] sm:$0xff] }
 0x3ff   :  { %2663 = vmatmul.msk.f32.vlgmr.msrb.gmra.mxu0 %vm648_vm4, %v646_v45  ;;  %2664 = vmatmul.msk.f32.vlgmr.msrb.gmra.mxu1 %vm648_vm4, %v647_v39  ;;  %v898_v39 = vunpack.c.h.b16 %v797_v22  ;;  %v2709_v22 = vor.u32 %v3268_v37, %v2706_v30 }
 0x400   :  { %707 = vmatpush.bf16.msra.mxu0 %v699_v42  ;;  %1074 = vmatpush.bf16.msra.mxu1 %v977_v31  ;;  %v801_v42 = vld [vmem:[%s4704_s11 + $0xa0] sm:$0x77]  ;;  %v798_v31 = vld [vmem:[%s4704_s11 + $0x88] sm:$0x77] }
 0x401   :  { %1103 = vmatpush.bf16.msrb.mxu2 %v2697_v50  ;;  %v899_v44 = vunpack.c.l.b16 %v798_v31 }
 0x403   :  { %v931_v51 = vpack.c.b16 %v899_v44, %v899_v44  ;;  %v3294_v44 = vld [vmem:[%s4706_s13 + $0x70] sm:$0xff] }
 0x404   :  { %708 = vmatpush.bf16.msra.mxu0 %v3263_v33  ;;  %1075 = vmatpush.bf16.msra.mxu1 %v2689_v54  ;;  %v4108_v33 = vld [vmem:[%s4704_s11 + $0xa8] sm:$0x77] }
 0x408   :  { %1018 = vmatpush.bf16.msrb.mxu0 %v965_v21 }
 0x40c   :  { %1019 = vmatpush.bf16.msrb.mxu0 %v2673_v2 }
 0x47c   :  { %v672_v36 = vpop.f32.mrf.mxu0  ;;  %v675_v23 = vpop.f32.mrf.mxu1 }
 0x47d   :  { %v678_v52 = vpack.c.bf16 %v675_v23, %v672_v36  ;;  %v905_v23 = vunpack.c.l.b16 %v801_v42 }
 0x47f   :  { %2669 = vmatmul.msk.bf16.vlgmr.msra.gmra.mxu0 %vm77_vm2, %v678_v52  ;;  %v906_v52 = vunpack.c.h.b16 %v801_v42 }
 0x4fc   :  { %v710_v27 = vpop.f32.mrf.mxu0 }
 0x4fd   :  { %v711_v35 = vadd.f32 %v3435_v53, %v710_v27  ;;  %v930_v27 = vpack.c.b16 %v898_v39, %v898_v39 }
 0x4ff   :  { %v715_v59 = vadd.f32 %v711_v35, %v3642_v8  ;;  %v3264_v35 = vld [vmem:[%s4704_s11 + $0x4] sm:$0xf]  ;;  %v968_v43 = vand.u32 %v930_v27, %v3633_v4 }
 0x501   :  { %v719_v5 = vsel %vm77_vm2, %v715_v59, 0.0  ;;  %1032 = vmatpush.bf16.msra.mxu0 %v968_v43 }
 0x502   :  { %720 = vadd.xlane.f32.xlu1 %v719_v5 }
 0x504   :  { %v712_v0 = vpop.f32.mrf.mxu0 }
 0x505   :  { %v713_v62 = vadd.f32 %v3435_v53, %v712_v0  ;;  %v907_v53 = vunpack.c.l.b16 %v4108_v33  ;;  %v937_v0 = vpack.c.b16 %v905_v23, %v905_v23  ;;  %v1001_v23 = vand.u32 %v941_v46, %v3633_v4  ;;  %v3318_v46 = vld [vmem:[%s4706_s13 + $0x130] sm:$0xff] }
 0x507   :  { %v716_v1 = vadd.f32 %v713_v62, %v3647_v9  ;;  %v938_v62 = vpack.c.b16 %v906_v52, %v906_v52  ;;  %v3273_v52 = vld [vmem:[%s4704_s11 + $0x44] sm:$0xf0] }
 0x509   :  { %v722_v18 = vsel %vm77_vm2, %v716_v1, 0.0 }
 0x50a   :  { %723 = vadd.xlane.f32.xlu2 %v722_v18  ;;  %v2674_v18 = vld [vmem:[%s4704_s11 + $0x40] sm:$0xf0] }
 0x575   :  { %v721_v8 = vpop.xlane.xlu1 %720 }
 0x576   :  { %v732_v16 = vmul.f32 %v4047_v12, %v721_v8  ;;  %v989_v8 = vand.u32 %v937_v0, %v3633_v4  ;;  %v2722_v0 = vld [vmem:[%s4704_s11 + $0x70] sm:$0xf0] }
 0x578   :  { %v4050_v34 = vsub.f32 %v715_v59, %v732_v16  ;;  %v992_v16 = vand.u32 %v938_v62, %v3633_v4  ;;  %1130 = vmatpush.bf16.msrb.mxu1 %v989_v8  ;;  %v2728_v62 = vld [vmem:[%s4704_s11 + $0x38] sm:$0xf]  ;;  %v3265_v8 = vld [vmem:[%s4704_s11 + $0xc] sm:$0xf] }
 0x57a   :  { %v736_v9 = vmul.f32 %v4050_v34, %v4050_v34  ;;  %1144 = vmatpush.bf16.msra.mxu3 %v992_v16  ;;  %v2682_v16 = vld [vmem:[%s4704_s11 + $0x48] sm:$0xf0] }
 0x57c   :  { %v738_v20 = vsel %vm77_vm2, %v736_v9, 0.0  ;;  %v2712_v9 = vld [vmem:[%s4704_s11 + $0x28] sm:$0xf] }
 0x57d   :  { %v724_v14 = vpop.xlane.xlu2 %723  ;;  %739 = vadd.xlane.f32.xlu0 %v738_v20  ;;  %v3277_v20 = vld [vmem:[%s4704_s11 + $0x64] sm:$0xf0] }
 0x57e   :  { %v733_v15 = vmul.f32 %v4047_v12, %v724_v14  ;;  %v2713_v25 = vor.u32 %v3277_v20, %v2712_v9  ;;  %1145 = vmatpush.bf16.msra.mxu3 %v2709_v22  ;;  %v2685_v9 = vor.u32 %v3265_v8, %v2682_v16  ;;  %v904_v20 = vunpack.c.h.b16 %v4070_v49  ;;  %v3323_v8 = vld [vmem:[%s4706_s13 + $0x158] sm:$0xff] }
 0x57f   :  { %v908_v22 = vunpack.c.h.b16 %v4108_v33  ;;  %v3335_v16 = vld [vmem:[%s4706_s13 + $0x1b8] sm:$0xff] }
 0x580   :  { %v4056_v26 = vsub.f32 %v716_v1, %v733_v15  ;;  %v939_v1 = vpack.c.b16 %v907_v53, %v907_v53  ;;  %v1004_v53 = vand.u32 %v942_v48, %v3633_v4  ;;  %v3290_v48 = vld [vmem:[%s4706_s13 + $0x50] sm:$0xff] }
 0x582   :  { %v737_v17 = vmul.f32 %v4056_v26, %v4056_v26  ;;  %v995_v15 = vand.u32 %v939_v1, %v3633_v4  ;;  %v3279_v1 = vld [vmem:[%s4704_s11 + $0x74] sm:$0xf0] }
 0x583   :  { %v2729_v43 = vor.u32 %v3279_v1, %v2728_v62  ;;  %v3310_v62 = vld [vmem:[%s4706_s13 + $0xf0] sm:$0xff]  ;;  %v3313_v1 = vld [vmem:[%s4706_s13 + $0x108] sm:$0xff] }
 0x584   :  { %v741_v19 = vsel %vm77_vm2, %v737_v17, 0.0  ;;  %v2677_v17 = vor.u32 %v3264_v35, %v2674_v18  ;;  %1158 = vmatpush.bf16.msra.mxu2 %v995_v15  ;;  %v2720_v35 = vld [vmem:[%s4704_s11 + $0x30] sm:$0xf] }
 0x585   :  { %742 = vadd.xlane.f32.xlu1 %v741_v19  ;;  %v2705_v19 = vor.u32 %v3276_v10, %v2704_v3  ;;  %v900_v10 = vunpack.c.h.b16 %v798_v31 }
 0x586   :  { %1033 = vmatpush.bf16.msra.mxu0 %v2677_v17  ;;  %v3267_v17 = vld [vmem:[%s4704_s11 + $0x1c] sm:$0xf] }
 0x587   :  { %1131 = vmatpush.bf16.msrb.mxu1 %v2705_v19  ;;  %v932_v37 = vpack.c.b16 %v900_v10, %v900_v10  ;;  %v2698_v19 = vld [vmem:[%s4704_s11 + $0x58] sm:$0xf0]  ;;  %v3324_v10 = vld [vmem:[%s4706_s13 + $0x160] sm:$0xff] }
 0x588   :  { %1159 = vmatpush.bf16.msra.mxu2 %v2713_v25  ;;  %v2701_v49 = vor.u32 %v3267_v17, %v2698_v19  ;;  %v3321_v17 = vld [vmem:[%s4706_s13 + $0x148] sm:$0xff] }
 0x589   :  { %v974_v30 = vand.u32 %v932_v37, %v3633_v4  ;;  %v3296_v37 = vld [vmem:[%s4706_s13 + $0x80] sm:$0xff]  ;;  %v3333_v19 = vld [vmem:[%s4706_s13 + $0x1a8] sm:$0xff] }
 0x5f0   :  { %v740_v40 = vpop.xlane.xlu0 %739 }
 0x5f1   :  { %v744_v41 = vmul.f32 %v740_v40, %v4047_v12 }
 0x5f3   :  { %v746_v11 = vadd.f32 1e-05, %v744_v41  ;;  %v4153_v41 = vld [vmem:[%s4704_s11 + $0xb8] sm:$0x77] }
 0x5f4   :  { %v911_v60 = vunpack.c.l.b16 %v4153_v41 }
 0x5f5   :  { %3499 = vrsqrt.f32 %v746_v11  ;;  %vm754_vm7 = vweird.f32 %v746_v11 }
 0x5f6   :  { %v943_v50 = vpack.c.b16 %v911_v60, %v911_v60  ;;  %v3293_v60 = vld [vmem:[%s4706_s13 + $0x68] sm:$0xff] }
 0x5f8   :  { %v743_v45 = vpop.xlane.xlu1 %742  ;;  %v1007_v27 = vand.u32 %v943_v50, %v3633_v4  ;;  %v3317_v50 = vld [vmem:[%s4706_s13 + $0x128] sm:$0xff] }
 0x5f9   :  { %v745_v36 = vmul.f32 %v743_v45, %v4047_v12 }
 0x5fb   :  { %v3500_v59 = vpop.eup %3499  ;;  %v747_v5 = vadd.f32 1e-05, %v745_v36  ;;  %v971_v36 = vand.u32 %v931_v51, %v3633_v4  ;;  %v3291_v51 = vld [vmem:[%s4706_s13 + $0x58] sm:$0xff] }
 0x5fc   :  { %v749_v7 = vmul.f32 %v3500_v59, %v746_v11  ;;  %vm755_vm6 = vweird.f32 %v3500_v59 }
 0x5fd   :  { %3501 = vrsqrt.f32 %v747_v5  ;;  %vm756_vm8 = vmor %vm754_vm7, %vm755_vm6  ;;  %vm764_vm10 = vweird.f32 %v747_v5 }
 0x5fe   :  { %v750_v14 = vmul.f32 %v3500_v59, %v749_v7 }
 0x600   :  { %v751_v24 = vmul.f32 0.5, %v750_v14  ;;  %v936_v14 = vpack.c.b16 %v904_v20, %v904_v20  ;;  %v3322_v20 = vld [vmem:[%s4706_s13 + $0x150] sm:$0xff] }
 0x602   :  { %v752_v28 = vsub.f32 1.5, %v751_v24  ;;  %v986_v15 = vand.u32 %v936_v14, %v3633_v4  ;;  %v940_v24 = vpack.c.b16 %v908_v22, %v908_v22  ;;  %v3334_v14 = vld [vmem:[%s4706_s13 + $0x1b0] sm:$0xff]  ;;  %v3320_v22 = vld [vmem:[%s4706_s13 + $0x140] sm:$0xff] }
 0x603   :  { %v3502_v58 = vpop.eup %3501 }
 0x604   :  { %v753_v56 = vmul.f32 %v3500_v59, %v752_v28  ;;  %v759_v29 = vmul.f32 %v3502_v58, %v747_v5  ;;  %vm765_vm9 = vweird.f32 %v3502_v58  ;;  %v3270_v5 = vld [vmem:[%s4704_s11 + $0x34] sm:$0xf]  ;;  %v998_v25 = vand.u32 %v940_v24, %v3633_v4  ;;  %v3269_v28 = vld [vmem:[%s4704_s11 + $0x2c] sm:$0xf]  ;;  %v3332_v24 = vld [vmem:[%s4706_s13 + $0x1a0] sm:$0xff] }
 0x605   :  { %vm766_vm11 = vmor %vm764_vm10, %vm765_vm9  ;;  %v2725_v7 = vor.u32 %v3270_v5, %v2722_v0  ;;  %v3314_v5 = vld [vmem:[%s4706_s13 + $0x110] sm:$0xff] }
 0x606   :  { %v760_v32 = vmul.f32 %v3502_v58, %v759_v29  ;;  %v757_v38 = vsel %vm756_vm8, %v3500_v59, %v753_v56  ;;  %v3278_v59 = vld [vmem:[%s4704_s11 + $0x6c] sm:$0xf0]  ;;  %v3287_v56 = vld [vmem:[%s4706_s13 + $0x38] sm:$0xff] }
 0x607   :  { %v768_v40 = vmul.f32 %v757_v38, %v4050_v34  ;;  %v2721_v3 = vor.u32 %v3278_v59, %v2720_v35  ;;  %v3286_v29 = vld [vmem:[%s4706_s13 + $0x30] sm:$0xff]  ;;  %v3285_v38 = vld [vmem:[%s4706_s13 + $0x28] sm:$0xff]  ;;  %v3299_v35 = vld [vmem:[%s4706_s13 + $0x98] sm:$0xff] }
 0x608   :  { %v761_v55 = vmul.f32 0.5, %v760_v32  ;;  %v912_v32 = vunpack.c.h.b16 %v4153_v41  ;;  %v3311_v59 = vld [vmem:[%s4706_s13 + $0xf8] sm:$0xff]  ;;  %v3326_v0 = vld [vmem:[%s4706_s13 + $0x170] sm:$0xff] }
 0x609   :  { %v773_v11 = vmul.f32 %v3436_v13, %v768_v40  ;;  %v3283_v40 = vld [vmem:[%s4706_s13 + $0x18] sm:$0xff] }
 0x60a   :  { %v762_v21 = vsub.f32 1.5, %v761_v55  ;;  %v944_v55 = vpack.c.b16 %v912_v32, %v912_v32 }
 0x60b   :  { %v4160_v45 = vadd.f32 %v3437_v57, %v773_v11  ;;  %v3280_v11 = vld [vmem:[%s4706_s13] sm:$0xff] }
 0x60c   :  { %v763_v47 = vmul.f32 %v3502_v58, %v762_v21  ;;  %v3284_v21 = vld [vmem:[%s4706_s13 + $0x20] sm:$0xff]  ;;  %v1010_v31 = vand.u32 %v944_v55, %v3633_v4  ;;  %v3295_v4 = vld [vmem:[%s4706_s13 + $0x78] sm:$0xff]  ;;  %v3342_v55 = vld [vmem:[%s4706_s13 + $0x1f0] sm:$0xff] }
 0x60e   :  { %v767_v2 = vsel %vm766_vm11, %v3502_v58, %v763_v47  ;;  %v2714_v58 = vld [vmem:[%s4704_s11 + $0x68] sm:$0xf0]  ;;  %v3282_v47 = vld [vmem:[%s4706_s13 + $0x10] sm:$0xff] }
 0x60f   :  { %v769_v34 = vmul.f32 %v767_v2, %v4056_v26  ;;  %v2680_v26 = vld [vmem:[%s4704_s11 + $0x8] sm:$0xf]  ;;  %v2717_v33 = vor.u32 %v3269_v28, %v2714_v58  ;;  %v3302_v2 = vld [vmem:[%s4706_s13 + $0xb0] sm:$0xff]  ;;  %v3304_v58 = vld [vmem:[%s4706_s13 + $0xc0] sm:$0xff] }
 0x610   :  { %v2681_v18 = vor.u32 %v3273_v52, %v2680_v26  ;;  %v3288_v26 = vld [vmem:[%s4706_s13 + $0x40] sm:$0xff] }
 0x611   :  { %v774_v54 = vmul.f32 %v3436_v13, %v769_v34  ;;  %v2730_v13 = vld [vmem:[%s4704_s11 + $0x78] sm:$0xf0]  ;;  %v3292_v34 = vld [vmem:[%s4706_s13 + $0x60] sm:$0xff] }
 0x612   :  { %v2733_v41 = vor.u32 %v3271_v61, %v2730_v13  ;;  %v3300_v52 = vld [vmem:[%s4706_s13 + $0xa0] sm:$0xff]  ;;  %v3329_v13 = vld [vmem:[%s4706_s13 + $0x188] sm:$0xff] }
 0x613   :  { %v4162_v39 = vadd.f32 %v3437_v57, %v774_v54  ;;  %v3301_v57 = vld [vmem:[%s4706_s13 + $0xa8] sm:$0xff]  ;;  %v3319_v54 = vld [vmem:[%s4706_s13 + $0x138] sm:$0xff] }
 0x615   :  { %v4166_v42 = vpack.c.bf16 %v4162_v39, %v4160_v45 }
 0x617   :  { %2734 = vmatmul.msk.bf16.vlgmr.msrb.gmra.mxu0 %vm77_vm2, %v4166_v42  ;;  %2738 = vmatmul.msk.bf16.vlgmr.msra.gmra.mxu1 %vm77_vm2, %v4166_v42 }
 0x618   :  { %2739 = vmatmul.msk.bf16.vlgmr.msrb.gmra.mxu3 %vm77_vm2, %v4166_v42  ;;  %2740 = vmatmul.msk.bf16.vlgmr.msrb.gmra.mxu2 %vm77_vm2, %v4166_v42 }
 0x619   :  { %1046 = vmatpush.bf16.msrb.mxu0 %v971_v36  ;;  %1186 = vmatpush.bf16.msra.mxu1 %v1001_v23  ;;  %v3289_v36 = vld [vmem:[%s4706_s13 + $0x48] sm:$0xff]  ;;  %v3316_v23 = vld [vmem:[%s4706_s13 + $0x120] sm:$0xff] }
 0x61a   :  { %1200 = vmatpush.bf16.msrb.mxu3 %v1004_v53  ;;  %1214 = vmatpush.bf16.msrb.mxu2 %v1007_v27  ;;  %v3315_v53 = vld [vmem:[%s4706_s13 + $0x118] sm:$0xff] }
 0x61b   :  { %v3327_v27 = vld [vmem:[%s4706_s13 + $0x178] sm:$0xff] }
 0x61d   :  { %1047 = vmatpush.bf16.msrb.mxu0 %v2681_v18  ;;  %1187 = vmatpush.bf16.msra.mxu1 %v2721_v3  ;;  %v3325_v18 = vld [vmem:[%s4706_s13 + $0x168] sm:$0xff] }
 0x61e   :  { %1201 = vmatpush.bf16.msrb.mxu3 %v2725_v7  ;;  %1215 = vmatpush.bf16.msrb.mxu2 %v2729_v43  ;;  %v3297_v3 = vld [vmem:[%s4706_s13 + $0x88] sm:$0xff]  ;;  %v3312_v43 = vld [vmem:[%s4706_s13 + $0x100] sm:$0xff] }
 0x61f   :  { %v3309_v7 = vld [vmem:[%s4706_s13 + $0xe8] sm:$0xff] }
 0x627   :  { %2735 = vmatmul.msk.bf16.vlgmr.msra.gmra.mxu0 %vm77_vm2, %v4166_v42  ;;  %2742 = vmatmul.msk.bf16.vlgmr.msrb.gmra.mxu1 %vm77_vm2, %v4166_v42 }
 0x628   :  { %2743 = vmatmul.msk.bf16.vlgmr.msra.gmra.mxu3 %vm77_vm2, %v4166_v42  ;;  %2744 = vmatmul.msk.bf16.vlgmr.msra.gmra.mxu2 %vm77_vm2, %v4166_v42 }
 0x629   :  { %1060 = vmatpush.bf16.msra.mxu0 %v974_v30  ;;  %2312 = vmatpush.bf16.msrb.mxu1 %v3287_v56  ;;  %v3308_v30 = vld [vmem:[%s4706_s13 + $0xe0] sm:$0xff]  ;;  %v3331_v56 = vld [vmem:[%s4706_s13 + $0x198] sm:$0xff] }
 0x62a   :  { %2326 = vmatpush.bf16.msra.mxu3 %v3295_v4  ;;  %2340 = vmatpush.bf16.msra.mxu2 %v3303_v6  ;;  %v3328_v6 = vld [vmem:[%s4706_s13 + $0x180] sm:$0xff] }
 0x62d   :  { %1061 = vmatpush.bf16.msra.mxu0 %v2685_v9  ;;  %2313 = vmatpush.bf16.msrb.mxu1 %v3286_v29  ;;  %v3307_v9 = vld [vmem:[%s4706_s13 + $0xd8] sm:$0xff] }
 0x62e   :  { %2327 = vmatpush.bf16.msra.mxu3 %v3294_v44  ;;  %2341 = vmatpush.bf16.msra.mxu2 %v3302_v2  ;;  %v3340_v2 = vld [vmem:[%s4706_s13 + $0x1e0] sm:$0xff] }
 0x631   :  { %2314 = vmatpush.bf16.msrb.mxu1 %v3285_v38  ;;  %v3330_v38 = vld [vmem:[%s4706_s13 + $0x190] sm:$0xff] }
 0x632   :  { %2328 = vmatpush.bf16.msra.mxu3 %v3293_v60  ;;  %2342 = vmatpush.bf16.msra.mxu2 %v3301_v57  ;;  %v3350_v57 = vld [vmem:[%s4706_s13 + $0x230] sm:$0xff] }
 0x635   :  { %2315 = vmatpush.bf16.msrb.mxu1 %v3284_v21 }
 0x636   :  { %2329 = vmatpush.bf16.msra.mxu3 %v3292_v34  ;;  %2343 = vmatpush.bf16.msra.mxu2 %v3300_v52  ;;  %v3348_v52 = vld [vmem:[%s4706_s13 + $0x220] sm:$0xff] }
 0x637   :  { %2736 = vmatmul.msk.bf16.vlgmr.msrb.gmra.mxu0 %vm77_vm2, %v4166_v42  ;;  %2746 = vmatmul.msk.bf16.vlgmr.msra.gmra.mxu1 %vm77_vm2, %v4166_v42 }
 0x638   :  { %2747 = vmatmul.msk.bf16.vlgmr.msrb.gmra.mxu3 %vm77_vm2, %v4166_v42  ;;  %2748 = vmatmul.msk.bf16.vlgmr.msrb.gmra.mxu2 %vm77_vm2, %v4166_v42 }
 0x639   :  { %1116 = vmatpush.bf16.msrb.mxu0 %v986_v15  ;;  %2316 = vmatpush.bf16.msrb.mxu1 %v3283_v40  ;;  %v3306_v15 = vld [vmem:[%s4706_s13 + $0xd0] sm:$0xff]  ;;  %v3341_v40 = vld [vmem:[%s4706_s13 + $0x1e8] sm:$0xff] }
 0x63a   :  { %2330 = vmatpush.bf16.msra.mxu3 %v3291_v51  ;;  %2344 = vmatpush.bf16.msra.mxu2 %v3299_v35  ;;  %v3349_v51 = vld [vmem:[%s4706_s13 + $0x228] sm:$0xff] }
 0x63d   :  { %1117 = vmatpush.bf16.msrb.mxu0 %v2701_v49  ;;  %2317 = vmatpush.bf16.msrb.mxu1 %v3282_v47  ;;  %v3305_v49 = vld [vmem:[%s4706_s13 + $0xc8] sm:$0xff]  ;;  %v3351_v47 = vld [vmem:[%s4706_s13 + $0x238] sm:$0xff] }
 0x63e   :  { %2331 = vmatpush.bf16.msra.mxu3 %v3290_v48 }
 0x641   :  { %2318 = vmatpush.bf16.msrb.mxu1 %v3281_v63 }
 0x642   :  { %2332 = vmatpush.bf16.msra.mxu3 %v3289_v36 }
 0x645   :  { %2319 = vmatpush.bf16.msrb.mxu1 %v3280_v11  ;;  %v3339_v11 = vld [vmem:[%s4706_s13 + $0x1d8] sm:$0xff] }
 0x646   :  { %2333 = vmatpush.bf16.msra.mxu3 %v3288_v26 }
 0x647   :  { %2737 = vmatmul.msk.bf16.vlgmr.msra.gmra.mxu0 %vm77_vm2, %v4166_v42 }
 0x648   :  { %1172 = vmatpush.bf16.msra.mxu0 %v998_v25  ;;  %v4415_v25 = vld [vmem:[%s4705_s12] sm:$0xff] }
 0x649   :  { %2368 = vmatpush.bf16.msra.mxu1 %v3319_v54  ;;  %v809_v29 = vperm.slane %v4415_v25, 0  ;;  %v813_v34 = vperm.slane %v4415_v25, 4  ;;  %v810_v54 = vperm.slane %v4415_v25, 1 }
 0x64a   :  { %2382 = vmatpush.bf16.msrb.mxu3 %v3327_v27 }
 0x64c   :  { %1173 = vmatpush.bf16.msra.mxu0 %v2717_v33  ;;  %v3343_v33 = vld [vmem:[%s4706_s13 + $0x1f8] sm:$0xff] }
 0x64d   :  { %2369 = vmatpush.bf16.msra.mxu1 %v3318_v46 }
 0x64e   :  { %2383 = vmatpush.bf16.msrb.mxu3 %v3326_v0 }
 0x651   :  { %2370 = vmatpush.bf16.msra.mxu1 %v3317_v50  ;;  %v3338_v50 = vld [vmem:[%s4706_s13 + $0x1d0] sm:$0xff] }
 0x652   :  { %2384 = vmatpush.bf16.msrb.mxu3 %v3325_v18 }
 0x655   :  { %2371 = vmatpush.bf16.msra.mxu1 %v3316_v23 }
 0x656   :  { %2385 = vmatpush.bf16.msrb.mxu3 %v3324_v10 }
 0x657   :  { %2741 = vmatmul.msk.bf16.vlgmr.msrb.gmra.mxu0 %vm77_vm2, %v4166_v42 }
 0x658   :  { %1228 = vmatpush.bf16.msrb.mxu0 %v1010_v31 }
 0x659   :  { %2372 = vmatpush.bf16.msra.mxu1 %v3315_v53 }
 0x65a   :  { %2386 = vmatpush.bf16.msrb.mxu3 %v3323_v8  ;;  %v4486_v8 = vld [vmem:[%s4705_s12 + $0x8] sm:$0xff] }
 0x65c   :  { %1229 = vmatpush.bf16.msrb.mxu0 %v2733_v41 }
 0x65d   :  { %2373 = vmatpush.bf16.msra.mxu1 %v3314_v5 }
 0x65e   :  { %2387 = vmatpush.bf16.msrb.mxu3 %v3322_v20  ;;  %v811_v20 = vperm.slane %v4415_v25, 2 }
 0x661   :  { %2374 = vmatpush.bf16.msra.mxu1 %v3313_v1  ;;  %v3359_v1 = vld [vmem:[%s4706_s13 + $0x278] sm:$0xff] }
 0x662   :  { %2388 = vmatpush.bf16.msrb.mxu3 %v3321_v17  ;;  %v3357_v17 = vld [vmem:[%s4706_s13 + $0x268] sm:$0xff] }
 0x665   :  { %2375 = vmatpush.bf16.msra.mxu1 %v3312_v43 }
 0x666   :  { %2389 = vmatpush.bf16.msrb.mxu3 %v3320_v22 }
 0x667   :  { %2745 = vmatmul.msk.bf16.vlgmr.msra.gmra.mxu0 %vm77_vm2, %v4166_v42 }
 0x668   :  { %2354 = vmatpush.bf16.msra.mxu0 %v3311_v59  ;;  %v3337_v59 = vld [vmem:[%s4706_s13 + $0x1c8] sm:$0xff] }
 0x66c   :  { %2355 = vmatpush.bf16.msra.mxu0 %v3310_v62  ;;  %v3347_v62 = vld [vmem:[%s4706_s13 + $0x218] sm:$0xff] }
 0x670   :  { %2356 = vmatpush.bf16.msra.mxu0 %v3309_v7  ;;  %v3336_v7 = vld [vmem:[%s4706_s13 + $0x1c0] sm:$0xff] }
 0x674   :  { %2357 = vmatpush.bf16.msra.mxu0 %v3308_v30  ;;  %v3358_v30 = vld [vmem:[%s4706_s13 + $0x270] sm:$0xff] }
 0x677   :  { %2749 = vmatmul.msk.bf16.vlgmr.msrb.gmra.mxu0 %vm77_vm2, %v4166_v42  ;;  %v3298_v42 = vld [vmem:[%s4706_s13 + $0x90] sm:$0xff] }
 0x678   :  { %2345 = vmatpush.bf16.msra.mxu2 %v3298_v42  ;;  %2358 = vmatpush.bf16.msra.mxu0 %v3307_v9 }
 0x67c   :  { %2346 = vmatpush.bf16.msra.mxu2 %v3297_v3  ;;  %2359 = vmatpush.bf16.msra.mxu0 %v3306_v15  ;;  %v3345_v15 = vld [vmem:[%s4706_s13 + $0x208] sm:$0xff] }
 0x680   :  { %2347 = vmatpush.bf16.msra.mxu2 %v3296_v37  ;;  %2360 = vmatpush.bf16.msra.mxu0 %v3305_v49  ;;  %v3346_v37 = vld [vmem:[%s4706_s13 + $0x210] sm:$0xff] }
 0x684   :  { %2396 = vmatpush.bf16.msrb.mxu2 %v3335_v16  ;;  %2361 = vmatpush.bf16.msra.mxu0 %v3304_v58  ;;  %v814_v16 = vperm.slane %v4415_v25, 5 }
 0x688   :  { %2397 = vmatpush.bf16.msrb.mxu2 %v3334_v14  ;;  %2410 = vmatpush.bf16.msrb.mxu0 %v3343_v33  ;;  %v817_v14 = vperm.slane %v4486_v8, 0  ;;  %v3344_v33 = vld [vmem:[%s4706_s13 + $0x200] sm:$0xff] }
 0x68c   :  { %2398 = vmatpush.bf16.msrb.mxu2 %v3333_v19  ;;  %2411 = vmatpush.bf16.msrb.mxu0 %v3342_v55 }
 0x690   :  { %2399 = vmatpush.bf16.msrb.mxu2 %v3332_v24  ;;  %2412 = vmatpush.bf16.msrb.mxu0 %v3341_v40 }
 0x694   :  { %v1021_v28 = vpop.f32.mrf.mxu0  ;;  %2400 = vmatpush.bf16.msrb.mxu2 %v3331_v56  ;;  %v1077_v32 = vpop.f32.mrf.mxu1  ;;  %2413 = vmatpush.bf16.msrb.mxu0 %v3340_v2  ;;  %v3382_v2 = vld [vmem:[%s4706_s13 + $0x330] sm:$0xff] }
 0x695   :  { %v1022_v21 = vadd.f32 %v1021_v28, %v809_v29  ;;  %v1078_v36 = vadd.f32 %v1077_v32, %v813_v34 }
 0x697   :  { %v1236_v4 = vmax.f32 %v1022_v21, 0.0  ;;  %v1240_v5 = vmax.f32 %v1078_v36, 0.0  ;;  %v3383_v21 = vld [vmem:[%s4706_s13 + $0x338] sm:$0xff]  ;;  %v3353_v36 = vld [vmem:[%s4706_s13 + $0x248] sm:$0xff] }
 0x698   :  { %2401 = vmatpush.bf16.msrb.mxu2 %v3330_v38  ;;  %2414 = vmatpush.bf16.msrb.mxu0 %v3339_v11  ;;  %v3354_v11 = vld [vmem:[%s4706_s13 + $0x250] sm:$0xff] }
 0x69b   :  { %v1091_v46 = vpop.f32.mrf.mxu3  ;;  %v1105_v19 = vpop.f32.mrf.mxu2 }
 0x69c   :  { %v1023_v31 = vpop.f32.mrf.mxu0  ;;  %2402 = vmatpush.bf16.msrb.mxu2 %v3329_v13  ;;  %v1079_v63 = vpop.f32.mrf.mxu1  ;;  %2415 = vmatpush.bf16.msrb.mxu0 %v3338_v50  ;;  %v1092_v24 = vadd.f32 %v1091_v46, %v814_v16  ;;  %v818_v50 = vperm.slane %v4486_v8, 1 }
 0x69d   :  { %v1024_v61 = vadd.f32 %v1023_v31, %v809_v29  ;;  %v1080_v48 = vadd.f32 %v1079_v63, %v813_v34  ;;  %v3356_v29 = vld [vmem:[%s4706_s13 + $0x260] sm:$0xff]  ;;  %v3366_v34 = vld [vmem:[%s4706_s13 + $0x2b0] sm:$0xff] }
 0x69f   :  { %v1252_v41 = vmax.f32 %v1024_v61, 0.0  ;;  %v1256_v53 = vmax.f32 %v1080_v48, 0.0  ;;  %v1241_v61 = vmax.f32 %v1092_v24, 0.0  ;;  %v812_v48 = vperm.slane %v4415_v25, 3 }
 0x6a0   :  { %2403 = vmatpush.bf16.msrb.mxu2 %v3328_v6  ;;  %2416 = vmatpush.bf16.msrb.mxu0 %v3337_v59  ;;  %v3367_v6 = vld [vmem:[%s4706_s13 + $0x2b8] sm:$0xff] }
 0x6a1   :  { %v1268_v44 = vpack.c.bf16 %v1252_v41, %v1236_v4  ;;  %v1272_v18 = vpack.c.bf16 %v1256_v53, %v1240_v5  ;;  %v3355_v41 = vld [vmem:[%s4706_s13 + $0x258] sm:$0xff]  ;;  %v3380_v53 = vld [vmem:[%s4706_s13 + $0x320] sm:$0xff] }
 0x6a3   :  { %2320 = vmatmul.bf16.vlgmr.msrb.gmra.mxu1 %v1268_v44  ;;  %v1093_v43 = vpop.f32.mrf.mxu3 }
 0x6a4   :  { %2424 = vmatpush.bf16.msrb.mxu1 %v3351_v47  ;;  %v1035_v60 = vpop.f32.mrf.mxu0  ;;  %v1133_v27 = vpop.f32.mrf.mxu1  ;;  %2417 = vmatpush.bf16.msrb.mxu0 %v3336_v7  ;;  %v1094_v49 = vadd.f32 %v1093_v43, %v814_v16  ;;  %v3379_v7 = vld [vmem:[%s4706_s13 + $0x318] sm:$0xff] }
 0x6a5   :  { %v1036_v23 = vadd.f32 %v1035_v60, %v810_v54  ;;  %v1134_v58 = vadd.f32 %v1133_v27, %v817_v14  ;;  %v1107_v60 = vpop.f32.mrf.mxu2 }
 0x6a6   :  { %v1257_v32 = vmax.f32 %v1094_v49, 0.0 }
 0x6a7   :  { %v1237_v0 = vmax.f32 %v1036_v23, 0.0  ;;  %v1244_v4 = vmax.f32 %v1134_v58, 0.0 }
 0x6a8   :  { %2425 = vmatpush.bf16.msrb.mxu1 %v3350_v57  ;;  %v1273_v47 = vpack.c.bf16 %v1257_v32, %v1241_v61 }
 0x6ab   :  { %v1147_v38 = vpop.f32.mrf.mxu3 }
 0x6ac   :  { %2426 = vmatpush.bf16.msrb.mxu1 %v3349_v51  ;;  %v1037_v26 = vpop.f32.mrf.mxu0  ;;  %v1135_v9 = vpop.f32.mrf.mxu1  ;;  %v815_v51 = vperm.slane %v4415_v25, 6  ;;  %v1148_v5 = vadd.f32 %v1147_v38, %v818_v50  ;;  %v3389_v38 = vld [vmem:[%s4706_s13 + $0x368] sm:$0xff] }
 0x6ad   :  { %v1038_v35 = vadd.f32 %v1037_v26, %v810_v54  ;;  %v1136_v22 = vadd.f32 %v1135_v9, %v817_v14  ;;  %v3381_v54 = vld [vmem:[%s4706_s13 + $0x328] sm:$0xff] }
 0x6ae   :  { %v1108_v23 = vadd.f32 %v1107_v60, %v815_v51  ;;  %v1245_v9 = vmax.f32 %v1148_v5, 0.0 }
 0x6af   :  { %v1253_v42 = vmax.f32 %v1038_v35, 0.0  ;;  %v1260_v31 = vmax.f32 %v1136_v22, 0.0  ;;  %v1106_v35 = vadd.f32 %v1105_v19, %v815_v51  ;;  %v3378_v19 = vld [vmem:[%s4706_s13 + $0x310] sm:$0xff] }
 0x6b0   :  { %2427 = vmatpush.bf16.msrb.mxu1 %v3348_v52  ;;  %v3365_v52 = vld [vmem:[%s4706_s13 + $0x2a8] sm:$0xff]  ;;  %v3390_v22 = vld [vmem:[%s4706_s13 + $0x370] sm:$0xff] }
 0x6b1   :  { %v1269_v3 = vpack.c.bf16 %v1253_v42, %v1237_v0  ;;  %v1276_v63 = vpack.c.bf16 %v1260_v31, %v1244_v4  ;;  %v3352_v42 = vld [vmem:[%s4706_s13 + $0x240] sm:$0xff]  ;;  %v819_v31 = vperm.slane %v4486_v8, 2 }
 0x6b2   :  { %v3376_v4 = vld [vmem:[%s4706_s13 + $0x300] sm:$0xff] }
 0x6b3   :  { %2334 = vmatmul.bf16.vlgmr.msra.gmra.mxu3 %v1269_v3  ;;  %2376 = vmatmul.bf16.vlgmr.msra.gmra.mxu1 %v1272_v18  ;;  %v1149_v46 = vpop.f32.mrf.mxu3  ;;  %v3364_v3 = vld [vmem:[%s4706_s13 + $0x2a0] sm:$0xff] }
 0x6b4   :  { %2428 = vmatpush.bf16.msrb.mxu1 %v3347_v62  ;;  %2438 = vmatpush.bf16.msra.mxu3 %v3359_v1  ;;  %v1049_v10 = vpop.f32.mrf.mxu0  ;;  %v1189_v26 = vpop.f32.mrf.mxu1  ;;  %v1150_v27 = vadd.f32 %v1149_v46, %v818_v50  ;;  %v1258_v62 = vmax.f32 %v1108_v23, 0.0  ;;  %v3387_v46 = vld [vmem:[%s4706_s13 + $0x358] sm:$0xff] }
 0x6b5   :  { %v1050_v28 = vadd.f32 %v1049_v10, %v811_v20  ;;  %v1161_v1 = vpop.f32.mrf.mxu2  ;;  %v3391_v10 = vld [vmem:[%s4706_s13 + $0x378] sm:$0xff] }
 0x6b6   :  { %v1261_v43 = vmax.f32 %v1150_v27, 0.0  ;;  %v3386_v27 = vld [vmem:[%s4706_s13 + $0x350] sm:$0xff] }
 0x6b7   :  { %v1238_v13 = vmax.f32 %v1050_v28, 0.0  ;;  %v821_v28 = vperm.slane %v4486_v8, 4 }
 0x6b8   :  { %2429 = vmatpush.bf16.msrb.mxu1 %v3346_v37  ;;  %2439 = vmatpush.bf16.msra.mxu3 %v3358_v30  ;;  %v1242_v37 = vmax.f32 %v1106_v35, 0.0  ;;  %v1277_v49 = vpack.c.bf16 %v1261_v43, %v1245_v9  ;;  %v3398_v35 = vld [vmem:[%s4706_s13 + $0x3b0] sm:$0xff] }
 0x6b9   :  { %v1190_v61 = vadd.f32 %v1189_v26, %v821_v28  ;;  %v3371_v26 = vld [vmem:[%s4706_s13 + $0x2d8] sm:$0xff] }
 0x6ba   :  { %v1274_v14 = vpack.c.bf16 %v1258_v62, %v1242_v37  ;;  %v3385_v62 = vld [vmem:[%s4706_s13 + $0x348] sm:$0xff]  ;;  %v3384_v37 = vld [vmem:[%s4706_s13 + $0x340] sm:$0xff] }
 0x6bc   :  { %2430 = vmatpush.bf16.msrb.mxu1 %v3345_v15  ;;  %2440 = vmatpush.bf16.msra.mxu3 %v3357_v17  ;;  %v1051_v56 = vpop.f32.mrf.mxu0  ;;  %v3363_v17 = vld [vmem:[%s4706_s13 + $0x298] sm:$0xff]  ;;  %v1191_v24 = vpop.f32.mrf.mxu1 }
 0x6bd   :  { %v1052_v55 = vadd.f32 %v1051_v56, %v811_v20  ;;  %v3375_v20 = vld [vmem:[%s4706_s13 + $0x2f8] sm:$0xff]  ;;  %v3374_v56 = vld [vmem:[%s4706_s13 + $0x2f0] sm:$0xff]  ;;  %v1192_v32 = vadd.f32 %v1191_v24, %v821_v28 }
 0x6bf   :  { %v1254_v40 = vmax.f32 %v1052_v55, 0.0  ;;  %v1163_v55 = vpop.f32.mrf.mxu2 }
 0x6c0   :  { %2431 = vmatpush.bf16.msrb.mxu1 %v3344_v33  ;;  %2441 = vmatpush.bf16.msra.mxu3 %v3356_v29  ;;  %v3362_v33 = vld [vmem:[%s4706_s13 + $0x290] sm:$0xff]  ;;  %v3377_v29 = vld [vmem:[%s4706_s13 + $0x308] sm:$0xff] }
 0x6c1   :  { %v1270_v44 = vpack.c.bf16 %v1254_v40, %v1238_v13  ;;  %v3373_v13 = vld [vmem:[%s4706_s13 + $0x2e8] sm:$0xff] }
 0x6c2   :  { %v3361_v40 = vld [vmem:[%s4706_s13 + $0x288] sm:$0xff] }
 0x6c3   :  { %2348 = vmatmul.bf16.vlgmr.msra.gmra.mxu2 %v1270_v44  ;;  %2390 = vmatmul.bf16.vlgmr.msrb.gmra.mxu3 %v1273_v47  ;;  %v1264_v47 = vmax.f32 %v1192_v32, 0.0  ;;  %v3388_v44 = vld [vmem:[%s4706_s13 + $0x360] sm:$0xff]  ;;  %v823_v32 = vperm.slane %v4486_v8, 6 }
 0x6c4   :  { %2480 = vmatpush.bf16.msra.mxu1 %v3383_v21  ;;  %2442 = vmatpush.bf16.msra.mxu3 %v3355_v41  ;;  %v1063_v57 = vpop.f32.mrf.mxu0  ;;  %v816_v21 = vperm.slane %v4415_v25, 7  ;;  %v1164_v41 = vadd.f32 %v1163_v55, %v819_v31  ;;  %v1203_v25 = vpop.f32.mrf.mxu3  ;;  %v3393_v55 = vld [vmem:[%s4706_s13 + $0x388] sm:$0xff] }
 0x6c5   :  { %2432 = vmatmul.bf16.vlgmr.msrb.gmra.mxu1 %v1276_v63  ;;  %2452 = vmatpush.bf16.msra.mxu2 %v3367_v6  ;;  %v1064_v59 = vadd.f32 %v1063_v57, %v812_v48  ;;  %v1248_v63 = vmax.f32 %v1190_v61, 0.0  ;;  %v3372_v57 = vld [vmem:[%s4706_s13 + $0x2e0] sm:$0xff] }
 0x6c7   :  { %v1239_v30 = vmax.f32 %v1064_v59, 0.0  ;;  %v1280_v51 = vpack.c.bf16 %v1264_v47, %v1248_v63  ;;  %v3401_v63 = vld [vmem:[%s4706_s13 + $0x3c8] sm:$0xff] }
 0x6c8   :  { %2481 = vmatpush.bf16.msra.mxu1 %v3382_v2  ;;  %2443 = vmatpush.bf16.msra.mxu3 %v3354_v11  ;;  %v1162_v2 = vadd.f32 %v1161_v1, %v819_v31  ;;  %v3397_v1 = vld [vmem:[%s4706_s13 + $0x3a8] sm:$0xff] }
 0x6c9   :  { %2453 = vmatpush.bf16.msra.mxu2 %v3366_v34  ;;  %v3360_v34 = vld [vmem:[%s4706_s13 + $0x280] sm:$0xff] }
 0x6ca   :  { %v1246_v23 = vmax.f32 %v1162_v2, 0.0  ;;  %v824_v2 = vperm.slane %v4486_v8, 7 }
 0x6cc   :  { %2482 = vmatpush.bf16.msra.mxu1 %v3381_v54  ;;  %2444 = vmatpush.bf16.msra.mxu3 %v3353_v36  ;;  %v1065_v0 = vpop.f32.mrf.mxu0  ;;  %v1262_v54 = vmax.f32 %v1164_v41, 0.0  ;;  %v1205_v59 = vpop.f32.mrf.mxu3 }
 0x6cd   :  { %2454 = vmatpush.bf16.msra.mxu2 %v3365_v52  ;;  %v1066_v18 = vadd.f32 %v1065_v0, %v812_v48  ;;  %v3399_v48 = vld [vmem:[%s4706_s13 + $0x3b8] sm:$0xff]  ;;  %v3370_v0 = vld [vmem:[%s4706_s13 + $0x2d0] sm:$0xff] }
 0x6cf   :  { %v1255_v16 = vmax.f32 %v1066_v18, 0.0 }
 0x6d0   :  { %2483 = vmatpush.bf16.msra.mxu1 %v3380_v53  ;;  %2445 = vmatpush.bf16.msra.mxu3 %v3352_v42  ;;  %v1278_v53 = vpack.c.bf16 %v1262_v54, %v1246_v23  ;;  %v822_v42 = vperm.slane %v4486_v8, 5 }
 0x6d1   :  { %v1271_v15 = vpack.c.bf16 %v1255_v16, %v1239_v30  ;;  %2455 = vmatpush.bf16.msra.mxu2 %v3364_v3  ;;  %v820_v3 = vperm.slane %v4486_v8, 3  ;;  %v3396_v30 = vld [vmem:[%s4706_s13 + $0x3a0] sm:$0xff] }
 0x6d2   :  { %v1206_v18 = vadd.f32 %v1205_v59, %v822_v42  ;;  %v1204_v43 = vadd.f32 %v1203_v25, %v822_v42  ;;  %v3403_v25 = vld [vmem:[%s4706_s13 + $0x3d8] sm:$0xff] }
 0x6d3   :  { %2362 = vmatmul.bf16.vlgmr.msra.gmra.mxu0 %v1271_v15  ;;  %2404 = vmatmul.bf16.vlgmr.msrb.gmra.mxu2 %v1274_v14  ;;  %v3368_v14 = vld [vmem:[%s4706_s13 + $0x2c0] sm:$0xff] }
 0x6d4   :  { %2484 = vmatpush.bf16.msra.mxu1 %v3379_v7  ;;  %2494 = vmatpush.bf16.msrb.mxu3 %v3391_v10  ;;  %v1119_v58 = vpop.f32.mrf.mxu0  ;;  %v3369_v7 = vld [vmem:[%s4706_s13 + $0x2c8] sm:$0xff]  ;;  %v1217_v10 = vpop.f32.mrf.mxu2  ;;  %v1265_v16 = vmax.f32 %v1206_v18, 0.0  ;;  %v1249_v15 = vmax.f32 %v1204_v43, 0.0 }
 0x6d5   :  { %2446 = vmatmul.bf16.vlgmr.msra.gmra.mxu3 %v1277_v49  ;;  %2466 = vmatpush.bf16.msra.mxu0 %v3375_v20  ;;  %v1120_v6 = vadd.f32 %v1119_v58, %v816_v21  ;;  %v3395_v49 = vld [vmem:[%s4706_s13 + $0x398] sm:$0xff]  ;;  %v1218_v31 = vadd.f32 %v1217_v10, %v823_v32 }
 0x6d6   :  { %2456 = vmatpush.bf16.msra.mxu2 %v3363_v17 }
 0x6d7   :  { %v1243_v50 = vmax.f32 %v1120_v6, 0.0  ;;  %v1250_v41 = vmax.f32 %v1218_v31, 0.0 }
 0x6d8   :  { %2485 = vmatpush.bf16.msra.mxu1 %v3378_v19  ;;  %2495 = vmatpush.bf16.msrb.mxu3 %v3390_v22  ;;  %v3407_v19 = vld [vmem:[%s4706_s13 + $0x3f8] sm:$0xff]  ;;  %v1281_v22 = vpack.c.bf16 %v1265_v16, %v1249_v15 }
 0x6d9   :  { %2467 = vmatpush.bf16.msra.mxu0 %v3374_v56  ;;  %v3406_v56 = vld [vmem:[%s4706_s13 + $0x3f0] sm:$0xff] }
 0x6da   :  { %2457 = vmatpush.bf16.msra.mxu2 %v3362_v33  ;;  %v3394_v33 = vld [vmem:[%s4706_s13 + $0x390] sm:$0xff] }
 0x6dc   :  { %2486 = vmatpush.bf16.msra.mxu1 %v3377_v29  ;;  %2496 = vmatpush.bf16.msrb.mxu3 %v3389_v38  ;;  %v1121_v60 = vpop.f32.mrf.mxu0  ;;  %v1219_v29 = vpop.f32.mrf.mxu2  ;;  %v3405_v38 = vld [vmem:[%s4706_s13 + $0x3e8] sm:$0xff] }
 0x6dd   :  { %2468 = vmatpush.bf16.msra.mxu0 %v3373_v13  ;;  %v1122_v11 = vadd.f32 %v1121_v60, %v816_v21  ;;  %v1220_v21 = vadd.f32 %v1219_v29, %v823_v32  ;;  %v3404_v13 = vld [vmem:[%s4706_s13 + $0x3e0] sm:$0xff] }
 0x6de   :  { %2458 = vmatpush.bf16.msra.mxu2 %v3361_v40  ;;  %v3392_v40 = vld [vmem:[%s4706_s13 + $0x380] sm:$0xff] }
 0x6df   :  { %v1259_v36 = vmax.f32 %v1122_v11, 0.0  ;;  %v3400_v11 = vld [vmem:[%s4706_s13 + $0x3c0] sm:$0xff] }
 0x6e0   :  { %2487 = vmatpush.bf16.msra.mxu1 %v3376_v4  ;;  %2497 = vmatpush.bf16.msrb.mxu3 %v3388_v44  ;;  %v1266_v4 = vmax.f32 %v1220_v21, 0.0  ;;  %v3402_v44 = vld [vmem:[%s4706_s13 + $0x3d0] sm:$0xff] }
 0x6e1   :  { %2469 = vmatpush.bf16.msra.mxu0 %v3372_v57  ;;  %v1275_v52 = vpack.c.bf16 %v1259_v36, %v1243_v50 }
 0x6e2   :  { %2459 = vmatpush.bf16.msra.mxu2 %v3360_v34  ;;  %v1282_v47 = vpack.c.bf16 %v1266_v4, %v1250_v41 }
 0x6e3   :  { %2488 = vmatmul.bf16.vlgmr.msra.gmra.mxu1 %v1280_v51  ;;  %2418 = vmatmul.bf16.vlgmr.msrb.gmra.mxu0 %v1275_v52  ;;  %v3438_v52 = vld [vmem:[%s4707_s14] ss:$0 sm:$0xff] }
 0x6e4   :  { %2498 = vmatpush.bf16.msrb.mxu3 %v3387_v46  ;;  %v1175_v5 = vpop.f32.mrf.mxu0 }
 0x6e5   :  { %2460 = vmatmul.bf16.vlgmr.msra.gmra.mxu2 %v1278_v53  ;;  %2470 = vmatpush.bf16.msra.mxu0 %v3371_v26  ;;  %v1176_v9 = vadd.f32 %v1175_v5, %v820_v3 }
 0x6e6   :  { %2508 = vmatpush.bf16.msrb.mxu2 %v3399_v48 }
 0x6e7   :  { %v1247_v24 = vmax.f32 %v1176_v9, 0.0 }
 0x6e8   :  { %2499 = vmatpush.bf16.msrb.mxu3 %v3386_v27 }
 0x6e9   :  { %2471 = vmatpush.bf16.msra.mxu0 %v3370_v0 }
 0x6ea   :  { %2509 = vmatpush.bf16.msrb.mxu2 %v3398_v35 }
 0x6ec   :  { %2500 = vmatpush.bf16.msrb.mxu3 %v3385_v62  ;;  %v1177_v20 = vpop.f32.mrf.mxu0 }
 0x6ed   :  { %2472 = vmatpush.bf16.msra.mxu0 %v3369_v7  ;;  %v1178_v17 = vadd.f32 %v1177_v20, %v820_v3 }
 0x6ee   :  { %2510 = vmatpush.bf16.msrb.mxu2 %v3397_v1 }
 0x6ef   :  { %v1263_v28 = vmax.f32 %v1178_v17, 0.0 }
 0x6f0   :  { %2501 = vmatpush.bf16.msrb.mxu3 %v3384_v37 }
 0x6f1   :  { %2473 = vmatpush.bf16.msra.mxu0 %v3368_v14  ;;  %v1279_v58 = vpack.c.bf16 %v1263_v28, %v1247_v24 }
 0x6f2   :  { %2511 = vmatpush.bf16.msrb.mxu2 %v3396_v30 }
 0x6f3   :  { %2502 = vmatmul.bf16.vlgmr.msrb.gmra.mxu3 %v1281_v22 }
 0x6f4   :  { %2474 = vmatmul.bf16.vlgmr.msra.gmra.mxu0 %v1279_v58  ;;  %v1231_v61 = vpop.f32.mrf.mxu0 }
 0x6f5   :  { %2522 = vmatpush.bf16.msrb.mxu0 %v3407_v19  ;;  %v1232_v57 = vadd.f32 %v1231_v61, %v824_v2 }
 0x6f6   :  { %2512 = vmatpush.bf16.msrb.mxu2 %v3395_v49 }
 0x6f7   :  { %v1251_v54 = vmax.f32 %v1232_v57, 0.0 }
 0x6f9   :  { %2523 = vmatpush.bf16.msrb.mxu0 %v3406_v56 }
 0x6fa   :  { %2513 = vmatpush.bf16.msrb.mxu2 %v3394_v33 }
 0x6fc   :  { %v1233_v6 = vpop.f32.mrf.mxu0 }
 0x6fd   :  { %2524 = vmatpush.bf16.msrb.mxu0 %v3405_v38  ;;  %v1234_v60 = vadd.f32 %v1233_v6, %v824_v2 }
 0x6fe   :  { %2514 = vmatpush.bf16.msrb.mxu2 %v3393_v55 }
 0x6ff   :  { %v1267_v34 = vmax.f32 %v1234_v60, 0.0 }
 0x701   :  { %2525 = vmatpush.bf16.msrb.mxu0 %v3404_v13  ;;  %v1283_v51 = vpack.c.bf16 %v1267_v34, %v1251_v54 }
 0x702   :  { %2515 = vmatpush.bf16.msrb.mxu2 %v3392_v40 }
 0x705   :  { %2516 = vmatmul.bf16.vlgmr.msrb.gmra.mxu2 %v1282_v47  ;;  %2526 = vmatpush.bf16.msrb.mxu0 %v3403_v25 }
 0x709   :  { %2527 = vmatpush.bf16.msrb.mxu0 %v3402_v44 }
 0x70d   :  { %2528 = vmatpush.bf16.msrb.mxu0 %v3401_v63 }
 0x711   :  { %2529 = vmatpush.bf16.msrb.mxu0 %v3400_v11 }
 0x714   :  { %2530 = vmatmul.bf16.vlgmr.msrb.gmra.mxu0 %v1283_v51 }
 0x720   :  { %v2321_v46 = vpop.f32.mrf.mxu1 }
 0x721   :  { %v2322_v35 = vadd.f32 %v3438_v52, %v2321_v46 }
 0x728   :  { %v2323_v50 = vpop.f32.mrf.mxu1 }
 0x729   :  { %v2324_v3 = vadd.f32 %v3438_v52, %v2323_v50 }
 0x730   :  { %v2377_v53 = vpop.f32.mrf.mxu1 }
 0x736   :  { %v2335_v48 = vpop.f32.mrf.mxu3 }
 0x737   :  { %v2336_v0 = vadd.f32 %v2335_v48, %v2322_v35 }
 0x738   :  { %v2379_v1 = vpop.f32.mrf.mxu1 }
 0x73e   :  { %v2337_v23 = vpop.f32.mrf.mxu3 }
 0x73f   :  { %v2338_v7 = vadd.f32 %v2337_v23, %v2324_v3 }
 0x742   :  { %v2433_v20 = vpop.f32.mrf.mxu1 }
 0x746   :  { %v2349_v8 = vpop.f32.mrf.mxu2  ;;  %v2391_v59 = vpop.f32.mrf.mxu3 }
 0x747   :  { %v2350_v42 = vadd.f32 %v2349_v8, %v2336_v0 }
 0x74a   :  { %v2435_v56 = vpop.f32.mrf.mxu1 }
 0x74e   :  { %v2351_v26 = vpop.f32.mrf.mxu2  ;;  %v2393_v10 = vpop.f32.mrf.mxu3 }
 0x74f   :  { %v2352_v30 = vadd.f32 %v2351_v26, %v2338_v7 }
 0x750   :  { %v2363_v36 = vpop.f32.mrf.mxu0 }
 0x751   :  { %v2364_v62 = vadd.f32 %v2363_v36, %v2350_v42 }
 0x753   :  { %v2378_v43 = vadd.f32 %v2377_v53, %v2364_v62 }
 0x755   :  { %v2392_v16 = vadd.f32 %v2391_v59, %v2378_v43 }
 0x756   :  { %v2405_v5 = vpop.f32.mrf.mxu2 }
 0x757   :  { %v2406_v15 = vadd.f32 %v2405_v5, %v2392_v16 }
 0x758   :  { %v2365_v27 = vpop.f32.mrf.mxu0  ;;  %v2447_v49 = vpop.f32.mrf.mxu3 }
 0x759   :  { %v2366_v9 = vadd.f32 %v2365_v27, %v2352_v30 }
 0x75b   :  { %v2380_v17 = vadd.f32 %v2379_v1, %v2366_v9 }
 0x75d   :  { %v2394_v24 = vadd.f32 %v2393_v10, %v2380_v17 }
 0x75e   :  { %v2407_v37 = vpop.f32.mrf.mxu2 }
 0x75f   :  { %v2408_v58 = vadd.f32 %v2407_v37, %v2394_v24  ;;  %v3440_v24 = vld [vmem:[%s4709_s16] ss:$0 sm:$0xff]  ;;  %s3538_s16 = smov 128  }
 0x760   :  { %v2419_v18 = vpop.f32.mrf.mxu0  ;;  %v2449_v38 = vpop.f32.mrf.mxu3 }
 0x761   :  { %v2420_v19 = vadd.f32 %v2419_v18, %v2406_v15  ;;  %v2489_v13 = vpop.f32.mrf.mxu1 }
 0x763   :  { %v2434_v28 = vadd.f32 %v2433_v20, %v2420_v19  ;;  %v3439_v19 = vld [vmem:[%s4708_s15] ss:$0 sm:$0xff]  ;;  %s3537_s15 = smov [#allocation2]  }
 0x764   :  { %s2600_s7 = sshll.u32 %s3537_s15, 4  ;;  %s2601_s7 = int_to_ptr.vmem [resolvable:$true] %s2600_s7 }
 0x765   :  { %v2448_v29 = vadd.f32 %v2447_v49, %v2434_v28 }
 0x768   :  { %v2421_v14 = vpop.f32.mrf.mxu0  ;;  %v2461_v22 = vpop.f32.mrf.mxu2 }
 0x769   :  { %v2422_v32 = vadd.f32 %v2421_v14, %v2408_v58  ;;  %v2462_v21 = vadd.f32 %v2461_v22, %v2448_v29  ;;  %v2491_v60 = vpop.f32.mrf.mxu1 }
 0x76b   :  { %v2436_v31 = vadd.f32 %v2435_v56, %v2422_v32 }
 0x76d   :  { %v2450_v40 = vadd.f32 %v2449_v38, %v2436_v31 }
 0x770   :  { %v2463_v55 = vpop.f32.mrf.mxu2 }
 0x771   :  { %v2475_v33 = vpop.f32.mrf.mxu0  ;;  %v2464_v44 = vadd.f32 %v2463_v55, %v2450_v40 }
 0x772   :  { %v2476_v61 = vadd.f32 %v2475_v33, %v2462_v21 }
 0x774   :  { %v2490_v41 = vadd.f32 %v2489_v13, %v2476_v61 }
 0x776   :  { %v2503_v25 = vpop.f32.mrf.mxu3 }
 0x777   :  { %v2504_v6 = vadd.f32 %v2503_v25, %v2490_v41 }
 0x779   :  { %v2477_v4 = vpop.f32.mrf.mxu0 }
 0x77a   :  { %v2478_v2 = vadd.f32 %v2477_v4, %v2464_v44 }
 0x77c   :  { %v2492_v11 = vadd.f32 %v2491_v60, %v2478_v2 }
 0x77e   :  { %v2505_v51 = vpop.f32.mrf.mxu3 }
 0x77f   :  { %v2506_v48 = vadd.f32 %v2505_v51, %v2492_v11 }
 0x788   :  { %v2517_v47 = vpop.f32.mrf.mxu2 }
 0x789   :  { %v2518_v63 = vadd.f32 %v2517_v47, %v2504_v6 }
 0x790   :  { %v2519_v46 = vpop.f32.mrf.mxu2 }
 0x791   :  { %v2531_v57 = vpop.f32.mrf.mxu0  ;;  %v2520_v50 = vadd.f32 %v2519_v46, %v2506_v48 }
 0x792   :  { %v2532_v34 = vadd.f32 %v2531_v57, %v2518_v63 }
 0x794   :  { %v2536_v54 = vadd.f32 %v2532_v34, %v4160_v45 }
 0x796   :  { %v2540_v8 = vsel %vm77_vm2, %v2536_v54, 0.0 }
 0x797   :  { %2541 = vadd.xlane.f32.xlu2 %v2540_v8 }
 0x799   :  { %v2533_v36 = vpop.f32.mrf.mxu0 }
 0x79a   :  { %v2534_v23 = vadd.f32 %v2533_v36, %v2520_v50 }
 0x79c   :  { %v2537_v26 = vadd.f32 %v2534_v23, %v4162_v39 }
 0x79e   :  { %v2543_v52 = vsel %vm77_vm2, %v2537_v26, 0.0 }
 0x79f   :  { %2544 = vadd.xlane.f32.xlu0 %v2543_v52 }
 0x80a   :  { %v2542_v53 = vpop.xlane.xlu2 %2541 }
 0x80b   :  { %v2546_v27 = vmul.f32 %v2542_v53, %v4047_v12 }
 0x80d   :  { %v2548_v35 = vsub.f32 %v2536_v54, %v2546_v27 }
 0x80f   :  { %v2550_v59 = vmul.f32 %v2548_v35, %v2548_v35 }
 0x811   :  { %v2552_v45 = vsel %vm77_vm2, %v2550_v59, 0.0 }
 0x812   :  { %v2545_v5 = vpop.xlane.xlu0 %2544  ;;  %2553 = vadd.xlane.f32.xlu1 %v2552_v45 }
 0x813   :  { %v2547_v0 = vmul.f32 %v2545_v5, %v4047_v12 }
 0x815   :  { %v2549_v42 = vsub.f32 %v2537_v26, %v2547_v0 }
 0x817   :  { %v2551_v62 = vmul.f32 %v2549_v42, %v2549_v42 }
 0x819   :  { %v2555_v1 = vsel %vm77_vm2, %v2551_v62, 0.0 }
 0x81a   :  { %2556 = vadd.xlane.f32.xlu2 %v2555_v1 }
 0x885   :  { %v2554_v39 = vpop.xlane.xlu1 %2553 }
 0x886   :  { %v2558_v18 = vmul.f32 %v2554_v39, %v4047_v12 }
 0x888   :  { %v2560_v3 = vadd.f32 1e-05, %v2558_v18 }
 0x88a   :  { %3503 = vrsqrt.f32 %v2560_v3  ;;  %vm2568_vm13 = vweird.f32 %v2560_v3 }
 0x88d   :  { %v2557_v7 = vpop.xlane.xlu2 %2556 }
 0x88e   :  { %v2559_v43 = vmul.f32 %v2557_v7, %v4047_v12 }
 0x890   :  { %v3504_v10 = vpop.eup %3503  ;;  %v2561_v37 = vadd.f32 1e-05, %v2559_v43 }
 0x891   :  { %v2563_v30 = vmul.f32 %v3504_v10, %v2560_v3  ;;  %vm2569_vm12 = vweird.f32 %v3504_v10 }
 0x892   :  { %3505 = vrsqrt.f32 %v2561_v37  ;;  %vm2570_vm14 = vmor %vm2568_vm13, %vm2569_vm12  ;;  %vm2578_vm0 = vweird.f32 %v2561_v37 }
 0x893   :  { %v2564_v16 = vmul.f32 %v3504_v10, %v2563_v30 }
 0x895   :  { %v2565_v9 = vmul.f32 0.5, %v2564_v16 }
 0x897   :  { %v2566_v20 = vsub.f32 1.5, %v2565_v9 }
 0x898   :  { %v3506_v14 = vpop.eup %3505 }
 0x899   :  { %v2567_v15 = vmul.f32 %v3504_v10, %v2566_v20  ;;  %v2573_v17 = vmul.f32 %v3506_v14, %v2561_v37  ;;  %vm2579_vm15 = vweird.f32 %v3506_v14 }
 0x89a   :  { %vm2580_vm1 = vmor %vm2578_vm0, %vm2579_vm15 }
 0x89b   :  { %v2571_v49 = vsel %vm2570_vm14, %v3504_v10, %v2567_v15  ;;  %v2574_v22 = vmul.f32 %v3506_v14, %v2573_v17 }
 0x89c   :  { %v2582_v12 = vmul.f32 %v2571_v49, %v2548_v35 }
 0x89d   :  { %v2575_v28 = vmul.f32 0.5, %v2574_v22 }
 0x89e   :  { %v2587_v58 = vmul.f32 %v3439_v19, %v2582_v12 }
 0x89f   :  { %v2576_v56 = vsub.f32 1.5, %v2575_v28 }
 0x8a0   :  { %v2592_v33 = vadd.f32 %v3440_v24, %v2587_v58 }
 0x8a1   :  { %v2577_v29 = vmul.f32 %v3506_v14, %v2576_v56 }
 0x8a2   :  { %2594 = vst.msk [vmem:[#allocation2] sm:$0xff] %vm77_vm2, %v2592_v33 }
 0x8a3   :  { %v2581_v32 = vsel %vm2580_vm1, %v3506_v14, %v2577_v29 }
 0x8a4   :  { %v2583_v38 = vmul.f32 %v2581_v32, %v2549_v42 }
 0x8a6   :  { %v2588_v55 = vmul.f32 %v3439_v19, %v2583_v38 }
 0x8a8   :  { %v2593_v21 = vadd.f32 %v3440_v24, %v2588_v55 }
 0x8aa   :  { %2595 = vst.msk [vmem:[#allocation2 + $0x8] sm:$0xff] %vm77_vm2, %v2593_v21 }
 0x8ab   :  { %2608 = dma.vmem_to_hbm [thread:$0]  %s2601_s7, 256, %s2603_s0, [#allocation3], %s3538_s16, %s3538_s16, %s3539_s5  }
 0x8ac   :  { %3531 = dma.done.wait [#allocation3], 256  }
 0x8ad   :  { %3532 = vsyncadd [#allocation3], 4294967040 }
 0x8ae   :  { %2613 = vsyncpa [#allocation3], 1 }

</bundles_post_ra>
